<compile_context>
chip_gen: v6e
topology: v6e:2x2x1
jax: 0.10.0
libtpu: 0.0.40
codegen_flags: <defaults>
</compile_context>

<pallas_src>
import functools
import math

import jax
import jax.numpy as jnp
from jax.experimental import pallas as pl
from jax.experimental.pallas import tpu as pltpu


_NEG_INF = -1e30


def _gelu_tanh(x):
    # PyTorch F.gelu(approximate='tanh'); tanh runs on the EUP.
    # Deviation from the exact erf GELU is < 1e-3, below bf16 matmul noise.
    c = 0.7978845608028654  # sqrt(2/pi)
    return 0.5 * x * (1.0 + jnp.tanh(c * (x + 0.044715 * x * x * x)))


def _layer_norm(x, gamma, beta, eps=1e-5):
    # var = E[x^2] - E[x]^2: two independent row reductions (overlap on XLU).
    mean = jnp.mean(x, axis=-1, keepdims=True)
    mean_sq = jnp.mean(x * x, axis=-1, keepdims=True)
    var = jnp.maximum(mean_sq - mean * mean, 0.0)
    return (x - mean) * jax.lax.rsqrt(var + eps) * gamma + beta


# ---------------------------------------------------------------------------
# Fused nn.TransformerEncoderLayer (post-norm, gelu, dropout=0) kernel.
# Processes Bt sequences per grid step; optionally fuses the final Linear on
# the pooled (row-0) token.
# ---------------------------------------------------------------------------
def encoder_layer_kernel(x_ref, wq_ref, bq_ref, wk_ref, bk_ref, wv_ref, bv_ref,
                         wo_ref, bo_ref, ln1g_ref, ln1b_ref,
                         w1_ref, b1_ref, w2_ref, b2_ref,
                         ln2g_ref, ln2b_ref, *rest,
                         num_heads, head_dim, seq_len, fuse_output):
    if fuse_output:
        wout_ref, bout_ref, o_ref = rest
    else:
        (o_ref,) = rest

    Bt, Tp, H = x_ref.shape
    M = Bt * Tp
    dh = head_dim
    scale = 1.0 / math.sqrt(dh)

    x = x_ref[...].reshape(M, H)                       # f32 residual stream
    xb = x.astype(jnp.bfloat16)

    # --- projections: one big (M, H) matmul each, bf16 in / f32 accumulate ---
    q = (jnp.dot(xb, wq_ref[...], preferred_element_type=jnp.float32)
         + bq_ref[...]) * scale                        # fold 1/sqrt(dh) into q
    k = jnp.dot(xb, wk_ref[...], preferred_element_type=jnp.float32) + bk_ref[...]
    v = jnp.dot(xb, wv_ref[...], preferred_element_type=jnp.float32) + bv_ref[...]

    # key-padding mask (only when the sequence axis was padded to 8k)
    if seq_len != Tp:
        kmask = jax.lax.broadcasted_iota(jnp.int32, (1, 1, Tp), 2) < seq_len
    else:
        kmask = None

    # --- attention: static loop over heads, batched over the Bt sequences ---
    heads = []
    for h in range(num_heads):
        sl = slice(h * dh, (h + 1) * dh)
        qh = q[:, sl].reshape(Bt, Tp, dh).astype(jnp.bfloat16)
        kh = k[:, sl].reshape(Bt, Tp, dh).astype(jnp.bfloat16)
        vh = v[:, sl].reshape(Bt, Tp, dh).astype(jnp.bfloat16)
        s = jnp.einsum('btd,bsd->bts', qh, kh,
                       preferred_element_type=jnp.float32)      # (Bt, Tp, Tp)
        if kmask is not None:
            s = jnp.where(kmask, s, _NEG_INF)
        s = s - jnp.max(s, axis=-1, keepdims=True)
        p = jnp.exp(s)
        p = p * pl.reciprocal(jnp.sum(p, axis=-1, keepdims=True), approx=True)
        ctx = jnp.einsum('bts,bsd->btd', p.astype(jnp.bfloat16), vh,
                         preferred_element_type=jnp.float32)    # (Bt, Tp, dh)
        heads.append(ctx.reshape(M, dh))
    ctx = jnp.concatenate(heads, axis=-1)              # (M, H) head concat
    attn = jnp.dot(ctx.astype(jnp.bfloat16), wo_ref[...],
                   preferred_element_type=jnp.float32) + bo_ref[...]

    # --- residual + norm1 ---
    h1 = _layer_norm(x + attn, ln1g_ref[...], ln1b_ref[...])

    # --- feed-forward (GELU) ---
    ff = jnp.dot(h1.astype(jnp.bfloat16), w1_ref[...],
                 preferred_element_type=jnp.float32) + b1_ref[...]
    ff = _gelu_tanh(ff)
    ff = jnp.dot(ff.astype(jnp.bfloat16), w2_ref[...],
                 preferred_element_type=jnp.float32) + b2_ref[...]

    # --- residual + norm2 ---
    h2 = _layer_norm(h1 + ff, ln2g_ref[...], ln2b_ref[...])

    if fuse_output:
        pooled = h2.reshape(Bt, Tp, H)[:, 0, :]        # global-token row, (Bt, H)
        out = jnp.dot(pooled.astype(jnp.bfloat16), wout_ref[...],
                      preferred_element_type=jnp.float32) + bout_ref[...]
        o_ref[...] = jnp.expand_dims(out, axis=1).astype(o_ref.dtype)
    else:
        o_ref[...] = h2.reshape(Bt, Tp, H).astype(o_ref.dtype)


def _choose_batch_tile(batch, seq, target_rows=256):
    """Smallest divisor of `batch` whose tile feeds >= target_rows to the MXU."""
    for d in range(1, batch + 1):
        if batch % d == 0 and d * seq >= target_rows:
            return d
    return batch


def _vmem_limit_bytes(bt, tp, hidden, mlp, e_pad, layer_params):
    f32 = 4
    m = bt * tp
    io = 4 * (bt * tp * hidden) * f32 + 2 * bt * e_pad * f32        # dbl-buffered I/O
    weights = 2 * sum(int(p.size) * p.dtype.itemsize for p in layer_params)
    weights += 2 * (hidden * e_pad * 2 + e_pad * f32)               # fused out proj
    inter = (6 * m * hidden + bt * tp * tp + 2 * m * mlp) * f32     # rough live temps
    est = int(1.5 * (io + weights + 2 * inter))
    return min(max(est, 32 * 1024 * 1024), 100 * 1024 * 1024)


def encoder_layer(x, layer_params, num_heads, seq_len, *, batch_tile,
                  fuse_output=False, out_proj=None, vmem_limit_bytes=None):
    B, Tp, H = x.shape
    head_dim = H // num_heads
    Bt = batch_tile
    kernel = functools.partial(encoder_layer_kernel, num_heads=num_heads,
                               head_dim=head_dim, seq_len=seq_len,
                               fuse_output=fuse_output)

    inputs = [x] + list(layer_params)
    in_specs = [pl.BlockSpec((Bt, Tp, H), lambda b: (b, 0, 0))]
    for w in layer_params:
        in_specs.append(pl.BlockSpec(w.shape, lambda b, n=w.ndim: (0,) * n))

    if fuse_output:
        w_out, b_out = out_proj
        e_pad = w_out.shape[1]
        inputs += [w_out, b_out]
        in_specs += [pl.BlockSpec(w_out.shape, lambda b: (0, 0)),
                     pl.BlockSpec(b_out.shape, lambda b: (0, 0))]
        out_shape = jax.ShapeDtypeStruct((B, 1, e_pad), x.dtype)
        out_specs = pl.BlockSpec((Bt, 1, e_pad), lambda b: (b, 0, 0))
    else:
        out_shape = jax.ShapeDtypeStruct((B, Tp, H), x.dtype)
        out_specs = pl.BlockSpec((Bt, Tp, H), lambda b: (b, 0, 0))

    return pl.pallas_call(
        kernel,
        out_shape=out_shape,
        grid=(B // Bt,),
        in_specs=in_specs,
        out_specs=out_specs,
        compiler_params=pltpu.CompilerParams(
            dimension_semantics=("parallel",),
            vmem_limit_bytes=vmem_limit_bytes),
    )(*inputs)


# ---------------------------------------------------------------------------
# Full forward (matches TransformerAggregator.forward, num_output_heads == 1)
# ---------------------------------------------------------------------------
def transformer_aggregator_forward(x, params, num_heads):
    B, S, H = x.shape
    gt = jnp.broadcast_to(params["global_token"],
                          (B,) + params["global_token"].shape[1:])
    h = jnp.concatenate([gt, x], axis=1)                       # (B, T, H)
    h = h + params["pos_embedding"][:, :h.shape[1], :]
    T = h.shape[1]

    # Pad sequence axis to a sublane multiple; padded keys are masked in-kernel.
    Tp = ((T + 7) // 8) * 8
    if Tp != T:
        h = jnp.pad(h, ((0, 0), (0, Tp - T), (0, 0)))

    Bt = _choose_batch_tile(B, Tp)

    # Lane-pad the output projection to a multiple of 128 for dense stores.
    W_out, b_out = params["W_out"], params["b_out"]
    E = W_out.shape[1]
    E_pad = max(128, ((E + 127) // 128) * 128)
    W_out_p = jnp.zeros((H, E_pad), W_out.dtype).at[:, :E].set(W_out)
    b_out_p = jnp.zeros((1, E_pad), b_out.dtype).at[:, :E].set(b_out)

    mlp = params["layers"][0][10].shape[1]
    vmem = _vmem_limit_bytes(Bt, Tp, H, mlp, E_pad, params["layers"][0])

    n_layers = len(params["layers"])
    for li, layer_params in enumerate(params["layers"]):
        if li == n_layers - 1:
            h = encoder_layer(h, layer_params, num_heads, T, batch_tile=Bt,
                              fuse_output=True, out_proj=(W_out_p, b_out_p),
                              vmem_limit_bytes=vmem)
        else:
            h = encoder_layer(h, layer_params, num_heads, T, batch_tile=Bt,
                              vmem_limit_bytes=vmem)

    # TODO(synk): only the num_output_heads == 1 path (return x[:, 0]) is implemented.
    return h[:, 0, :E]                                          # (B, emb)


# ---------------------------------------------------------------------------
# Deterministic parameter init (shapes implied by the module's __init__);
# matmul weights live in bf16 (f32 accumulation), biases / LN params in f32.
# ---------------------------------------------------------------------------
def init_params(key, seq_len, heads, hidden, mlp, num_layers, emb,
                num_output_heads=1):
    del heads  # head count only matters at forward time
    keys = jax.random.split(key, 4 + num_layers)

    def w(k, shape):
        return (0.02 * jax.random.normal(k, shape, jnp.float32)).astype(jnp.bfloat16)

    params = {
        "pos_embedding": 0.02 * jax.random.normal(
            keys[0], (1, seq_len + num_output_heads, hidden), jnp.float32),
        "global_token": 0.02 * jax.random.normal(
            keys[1], (1, num_output_heads, hidden), jnp.float32),
        "W_out": w(keys[2], (hidden, emb)),
        "b_out": jnp.zeros((1, emb), jnp.float32),
    }
    layers = []
    for l in range(num_layers):
        lk = jax.random.split(keys[4 + l], 6)
        layers.append([
            w(lk[0], (hidden, hidden)), jnp.zeros((1, hidden), jnp.float32),   # Wq, bq
            w(lk[1], (hidden, hidden)), jnp.zeros((1, hidden), jnp.float32),   # Wk, bk
            w(lk[2], (hidden, hidden)), jnp.zeros((1, hidden), jnp.float32),   # Wv, bv
            w(lk[3], (hidden, hidden)), jnp.zeros((1, hidden), jnp.float32),   # Wo, bo
            jnp.ones((1, hidden), jnp.float32),                                # ln1 gamma
            jnp.zeros((1, hidden), jnp.float32),                               # ln1 beta
            w(lk[4], (hidden, mlp)), jnp.zeros((1, mlp), jnp.float32),         # W1, b1
            w(lk[5], (mlp, hidden)), jnp.zeros((1, hidden), jnp.float32),      # W2, b2
            jnp.ones((1, hidden), jnp.float32),                                # ln2 gamma
            jnp.zeros((1, hidden), jnp.float32),                               # ln2 beta
        ])
    params["layers"] = layers
    return params


if __name__ == "__main__":
    # small config consistent with the module's forward:
    B, S, HEADS, HIDDEN, MLP, LAYERS, EMB = 2, 8, 4, 32, 64, 2, 16
    key = jax.random.PRNGKey(0)
    pkey, xkey = jax.random.split(key)
    params = init_params(pkey, S, HEADS, HIDDEN, MLP, LAYERS, EMB)
    x = jax.random.normal(xkey, (B, S, HIDDEN), jnp.float32)

    out = transformer_aggregator_forward(x, params, HEADS)
    out = jax.block_until_ready(out)
    assert out.shape == (B, EMB), out.shape
    assert bool(jnp.all(jnp.isfinite(out))), "non-finite output"
    print("KERNEL_OK")
</pallas_src>

<mosaic_0001>
module attributes {stable_mosaic.version = 11 : i64} {
  func.func @encoder_layer_kernel(%arg0: i32, %arg1: memref<2x16x32xf32, #tpu.memory_space<vmem>>, %arg2: memref<32x32xbf16, #tpu.memory_space<vmem>>, %arg3: memref<1x32xf32, #tpu.memory_space<vmem>>, %arg4: memref<32x32xbf16, #tpu.memory_space<vmem>>, %arg5: memref<1x32xf32, #tpu.memory_space<vmem>>, %arg6: memref<32x32xbf16, #tpu.memory_space<vmem>>, %arg7: memref<1x32xf32, #tpu.memory_space<vmem>>, %arg8: memref<32x32xbf16, #tpu.memory_space<vmem>>, %arg9: memref<1x32xf32, #tpu.memory_space<vmem>>, %arg10: memref<1x32xf32, #tpu.memory_space<vmem>>, %arg11: memref<1x32xf32, #tpu.memory_space<vmem>>, %arg12: memref<32x64xbf16, #tpu.memory_space<vmem>>, %arg13: memref<1x64xf32, #tpu.memory_space<vmem>>, %arg14: memref<64x32xbf16, #tpu.memory_space<vmem>>, %arg15: memref<1x32xf32, #tpu.memory_space<vmem>>, %arg16: memref<1x32xf32, #tpu.memory_space<vmem>>, %arg17: memref<1x32xf32, #tpu.memory_space<vmem>>, %arg18: memref<2x16x32xf32, #tpu.memory_space<vmem>>) attributes {dimension_semantics = [#tpu.dimension_semantics<parallel>], iteration_bounds = array<i64: 1>, scalar_prefetch = 0 : i64, scratch_operands = 0 : i64, tpu.core_type = #tpu.core_type<tc>, window_params = [{transform_indices = @transform_0, window_bounds = array<i64: 2, 16, 32>}, {pipeline_mode = #tpu.pipeline_mode<synchronous>, transform_indices = @transform_1, window_bounds = array<i64: 32, 32>}, {pipeline_mode = #tpu.pipeline_mode<synchronous>, transform_indices = @transform_2, window_bounds = array<i64: 1, 32>}, {pipeline_mode = #tpu.pipeline_mode<synchronous>, transform_indices = @transform_3, window_bounds = array<i64: 32, 32>}, {pipeline_mode = #tpu.pipeline_mode<synchronous>, transform_indices = @transform_4, window_bounds = array<i64: 1, 32>}, {pipeline_mode = #tpu.pipeline_mode<synchronous>, transform_indices = @transform_5, window_bounds = array<i64: 32, 32>}, {pipeline_mode = #tpu.pipeline_mode<synchronous>, transform_indices = @transform_6, window_bounds = array<i64: 1, 32>}, {pipeline_mode = #tpu.pipeline_mode<synchronous>, transform_indices = @transform_7, window_bounds = array<i64: 32, 32>}, {pipeline_mode = #tpu.pipeline_mode<synchronous>, transform_indices = @transform_8, window_bounds = array<i64: 1, 32>}, {pipeline_mode = #tpu.pipeline_mode<synchronous>, transform_indices = @transform_9, window_bounds = array<i64: 1, 32>}, {pipeline_mode = #tpu.pipeline_mode<synchronous>, transform_indices = @transform_10, window_bounds = array<i64: 1, 32>}, {pipeline_mode = #tpu.pipeline_mode<synchronous>, transform_indices = @transform_11, window_bounds = array<i64: 32, 64>}, {pipeline_mode = #tpu.pipeline_mode<synchronous>, transform_indices = @transform_12, window_bounds = array<i64: 1, 64>}, {pipeline_mode = #tpu.pipeline_mode<synchronous>, transform_indices = @transform_13, window_bounds = array<i64: 64, 32>}, {pipeline_mode = #tpu.pipeline_mode<synchronous>, transform_indices = @transform_14, window_bounds = array<i64: 1, 32>}, {pipeline_mode = #tpu.pipeline_mode<synchronous>, transform_indices = @transform_15, window_bounds = array<i64: 1, 32>}, {pipeline_mode = #tpu.pipeline_mode<synchronous>, transform_indices = @transform_16, window_bounds = array<i64: 1, 32>}, {transform_indices = @transform_17, window_bounds = array<i64: 2, 16, 32>}]} {
    %c0 = arith.constant 0 : index
    %c0_0 = arith.constant 0 : index
    %c0_1 = arith.constant 0 : index
    %0 = vector.load %arg1[%c0, %c0_0, %c0_1] : memref<2x16x32xf32, #tpu.memory_space<vmem>>, vector<2x16x32xf32>
    %1 = vector.shape_cast %0 : vector<2x16x32xf32> to vector<32x32xf32>
    %2 = arith.truncf %1 : vector<32x32xf32> to vector<32x32xbf16>
    %c0_2 = arith.constant 0 : index
    %c0_3 = arith.constant 0 : index
    %3 = vector.load %arg2[%c0_2, %c0_3] : memref<32x32xbf16, #tpu.memory_space<vmem>>, vector<32x32xbf16>
    %cst = arith.constant dense<0.000000e+00> : vector<32x32xf32>
    %4 = tpu.matmul %2, %3, %cst {dimension_numbers = #tpu.dot_dimension_numbers<[1], [0], [0], [1], [0, 0, 1, 1], [], []>} : vector<32x32xbf16>, vector<32x32xbf16>, vector<32x32xf32> -> vector<32x32xf32>
    %c0_4 = arith.constant 0 : index
    %c0_5 = arith.constant 0 : index
    %5 = vector.load %arg3[%c0_4, %c0_5] : memref<1x32xf32, #tpu.memory_space<vmem>>, vector<1x32xf32>
    %6 = vector.broadcast %5 : vector<1x32xf32> to vector<32x32xf32>
    %7 = arith.addf %4, %6 : vector<32x32xf32>
    %cst_6 = arith.constant 0.353553385 : f32
    %8 = vector.broadcast %cst_6 : f32 to vector<32x32xf32>
    %9 = arith.mulf %7, %8 : vector<32x32xf32>
    %c0_7 = arith.constant 0 : index
    %c0_8 = arith.constant 0 : index
    %10 = vector.load %arg4[%c0_7, %c0_8] : memref<32x32xbf16, #tpu.memory_space<vmem>>, vector<32x32xbf16>
    %cst_9 = arith.constant dense<0.000000e+00> : vector<32x32xf32>
    %11 = tpu.matmul %2, %10, %cst_9 {dimension_numbers = #tpu.dot_dimension_numbers<[1], [0], [0], [1], [0, 0, 1, 1], [], []>} : vector<32x32xbf16>, vector<32x32xbf16>, vector<32x32xf32> -> vector<32x32xf32>
    %c0_10 = arith.constant 0 : index
    %c0_11 = arith.constant 0 : index
    %12 = vector.load %arg5[%c0_10, %c0_11] : memref<1x32xf32, #tpu.memory_space<vmem>>, vector<1x32xf32>
    %13 = vector.broadcast %12 : vector<1x32xf32> to vector<32x32xf32>
    %14 = arith.addf %11, %13 : vector<32x32xf32>
    %c0_12 = arith.constant 0 : index
    %c0_13 = arith.constant 0 : index
    %15 = vector.load %arg6[%c0_12, %c0_13] : memref<32x32xbf16, #tpu.memory_space<vmem>>, vector<32x32xbf16>
    %cst_14 = arith.constant dense<0.000000e+00> : vector<32x32xf32>
    %16 = tpu.matmul %2, %15, %cst_14 {dimension_numbers = #tpu.dot_dimension_numbers<[1], [0], [0], [1], [0, 0, 1, 1], [], []>} : vector<32x32xbf16>, vector<32x32xbf16>, vector<32x32xf32> -> vector<32x32xf32>
    %c0_15 = arith.constant 0 : index
    %c0_16 = arith.constant 0 : index
    %17 = vector.load %arg7[%c0_15, %c0_16] : memref<1x32xf32, #tpu.memory_space<vmem>>, vector<1x32xf32>
    %18 = vector.broadcast %17 : vector<1x32xf32> to vector<32x32xf32>
    %19 = arith.addf %16, %18 : vector<32x32xf32>
    %20 = tpu.iota {dimensions = array<i32: 2>} : vector<1x1x16xi32>
    %c9_i32 = arith.constant 9 : i32
    %21 = vector.broadcast %c9_i32 : i32 to vector<1x1x16xi32>
    %22 = arith.cmpi slt, %20, %21 : vector<1x1x16xi32>
    %23 = vector.extract_strided_slice %9 {offsets = [0, 0], sizes = [32, 8], strides = [1, 1]} : vector<32x32xf32> to vector<32x8xf32>
    %24 = vector.shape_cast %23 : vector<32x8xf32> to vector<2x16x8xf32>
    %25 = arith.truncf %24 : vector<2x16x8xf32> to vector<2x16x8xbf16>
    %26 = vector.extract_strided_slice %14 {offsets = [0, 0], sizes = [32, 8], strides = [1, 1]} : vector<32x32xf32> to vector<32x8xf32>
    %27 = vector.shape_cast %26 : vector<32x8xf32> to vector<2x16x8xf32>
    %28 = arith.truncf %27 : vector<2x16x8xf32> to vector<2x16x8xbf16>
    %29 = vector.extract_strided_slice %19 {offsets = [0, 0], sizes = [32, 8], strides = [1, 1]} : vector<32x32xf32> to vector<32x8xf32>
    %30 = vector.shape_cast %29 : vector<32x8xf32> to vector<2x16x8xf32>
    %31 = arith.truncf %30 : vector<2x16x8xf32> to vector<2x16x8xbf16>
    "tpu.trace_start"() <{level = 10 : i32, message = "btd,bsd->bts"}> : () -> ()
    %cst_17 = arith.constant dense<0.000000e+00> : vector<2x16x16xf32>
    %32 = tpu.matmul %25, %28, %cst_17 {dimension_numbers = #tpu.dot_dimension_numbers<[2], [2], [1], [1], [0, 0, 0, 1, 1, 1], [0], [0]>} : vector<2x16x8xbf16>, vector<2x16x8xbf16>, vector<2x16x16xf32> -> vector<2x16x16xf32>
    %cst_18 = arith.constant -1.000000e+30 : f32
    "tpu.trace_stop"() : () -> ()
    %33 = vector.shape_cast %22 : vector<1x1x16xi1> to vector<1x1x16xi1>
    %34 = vector.broadcast %33 : vector<1x1x16xi1> to vector<2x16x16xi1>
    %35 = vector.broadcast %cst_18 : f32 to vector<2x16x16xf32>
    %36 = arith.select %34, %32, %35 : vector<2x16x16xi1>, vector<2x16x16xf32>
    %cst_19 = arith.constant dense<0xFF800000> : vector<2x16xf32>
    %37 = vector.multi_reduction <maximumf>, %36, %cst_19 [2] : vector<2x16x16xf32> to vector<2x16xf32>
    %38 = vector.shape_cast %37 : vector<2x16xf32> to vector<2x16x1xf32>
    %39 = vector.broadcast %38 : vector<2x16x1xf32> to vector<2x16x16xf32>
    %40 = arith.subf %36, %39 : vector<2x16x16xf32>
    %41 = math.exp %40 : vector<2x16x16xf32>
    %cst_20 = arith.constant dense<0.000000e+00> : vector<2x16xf32>
    %42 = vector.multi_reduction <add>, %41, %cst_20 [2] : vector<2x16x16xf32> to vector<2x16xf32>
    %43 = vector.shape_cast %42 : vector<2x16xf32> to vector<2x16x1xf32>
    %44 = tpu.reciprocal %43 {approx = true} : vector<2x16x1xf32> -> vector<2x16x1xf32>
    %45 = vector.broadcast %44 : vector<2x16x1xf32> to vector<2x16x16xf32>
    %46 = arith.mulf %41, %45 : vector<2x16x16xf32>
    %47 = arith.truncf %46 : vector<2x16x16xf32> to vector<2x16x16xbf16>
    "tpu.trace_start"() <{level = 10 : i32, message = "bts,bsd->btd"}> : () -> ()
    %cst_21 = arith.constant dense<0.000000e+00> : vector<2x16x8xf32>
    %48 = tpu.matmul %47, %31, %cst_21 {dimension_numbers = #tpu.dot_dimension_numbers<[2], [1], [1], [2], [0, 0, 0, 1, 1, 2], [0], [0]>} : vector<2x16x16xbf16>, vector<2x16x8xbf16>, vector<2x16x8xf32> -> vector<2x16x8xf32>
    "tpu.trace_stop"() : () -> ()
    %49 = vector.shape_cast %48 : vector<2x16x8xf32> to vector<32x8xf32>
    %50 = vector.extract_strided_slice %9 {offsets = [0, 8], sizes = [32, 8], strides = [1, 1]} : vector<32x32xf32> to vector<32x8xf32>
    %51 = vector.shape_cast %50 : vector<32x8xf32> to vector<2x16x8xf32>
    %52 = arith.truncf %51 : vector<2x16x8xf32> to vector<2x16x8xbf16>
    %53 = vector.extract_strided_slice %14 {offsets = [0, 8], sizes = [32, 8], strides = [1, 1]} : vector<32x32xf32> to vector<32x8xf32>
    %54 = vector.shape_cast %53 : vector<32x8xf32> to vector<2x16x8xf32>
    %55 = arith.truncf %54 : vector<2x16x8xf32> to vector<2x16x8xbf16>
    %56 = vector.extract_strided_slice %19 {offsets = [0, 8], sizes = [32, 8], strides = [1, 1]} : vector<32x32xf32> to vector<32x8xf32>
    %57 = vector.shape_cast %56 : vector<32x8xf32> to vector<2x16x8xf32>
    %58 = arith.truncf %57 : vector<2x16x8xf32> to vector<2x16x8xbf16>
    "tpu.trace_start"() <{level = 10 : i32, message = "btd,bsd->bts"}> : () -> ()
    %cst_22 = arith.constant dense<0.000000e+00> : vector<2x16x16xf32>
    %59 = tpu.matmul %52, %55, %cst_22 {dimension_numbers = #tpu.dot_dimension_numbers<[2], [2], [1], [1], [0, 0, 0, 1, 1, 1], [0], [0]>} : vector<2x16x8xbf16>, vector<2x16x8xbf16>, vector<2x16x16xf32> -> vector<2x16x16xf32>
    %cst_23 = arith.constant -1.000000e+30 : f32
    "tpu.trace_stop"() : () -> ()
    %60 = vector.shape_cast %22 : vector<1x1x16xi1> to vector<1x1x16xi1>
    %61 = vector.broadcast %60 : vector<1x1x16xi1> to vector<2x16x16xi1>
    %62 = vector.broadcast %cst_23 : f32 to vector<2x16x16xf32>
    %63 = arith.select %61, %59, %62 : vector<2x16x16xi1>, vector<2x16x16xf32>
    %cst_24 = arith.constant dense<0xFF800000> : vector<2x16xf32>
    %64 = vector.multi_reduction <maximumf>, %63, %cst_24 [2] : vector<2x16x16xf32> to vector<2x16xf32>
    %65 = vector.shape_cast %64 : vector<2x16xf32> to vector<2x16x1xf32>
    %66 = vector.broadcast %65 : vector<2x16x1xf32> to vector<2x16x16xf32>
    %67 = arith.subf %63, %66 : vector<2x16x16xf32>
    %68 = math.exp %67 : vector<2x16x16xf32>
    %cst_25 = arith.constant dense<0.000000e+00> : vector<2x16xf32>
    %69 = vector.multi_reduction <add>, %68, %cst_25 [2] : vector<2x16x16xf32> to vector<2x16xf32>
    %70 = vector.shape_cast %69 : vector<2x16xf32> to vector<2x16x1xf32>
    %71 = tpu.reciprocal %70 {approx = true} : vector<2x16x1xf32> -> vector<2x16x1xf32>
    %72 = vector.broadcast %71 : vector<2x16x1xf32> to vector<2x16x16xf32>
    %73 = arith.mulf %68, %72 : vector<2x16x16xf32>
    %74 = arith.truncf %73 : vector<2x16x16xf32> to vector<2x16x16xbf16>
    "tpu.trace_start"() <{level = 10 : i32, message = "bts,bsd->btd"}> : () -> ()
    %cst_26 = arith.constant dense<0.000000e+00> : vector<2x16x8xf32>
    %75 = tpu.matmul %74, %58, %cst_26 {dimension_numbers = #tpu.dot_dimension_numbers<[2], [1], [1], [2], [0, 0, 0, 1, 1, 2], [0], [0]>} : vector<2x16x16xbf16>, vector<2x16x8xbf16>, vector<2x16x8xf32> -> vector<2x16x8xf32>
    "tpu.trace_stop"() : () -> ()
    %76 = vector.shape_cast %75 : vector<2x16x8xf32> to vector<32x8xf32>
    %77 = vector.extract_strided_slice %9 {offsets = [0, 16], sizes = [32, 8], strides = [1, 1]} : vector<32x32xf32> to vector<32x8xf32>
    %78 = vector.shape_cast %77 : vector<32x8xf32> to vector<2x16x8xf32>
    %79 = arith.truncf %78 : vector<2x16x8xf32> to vector<2x16x8xbf16>
    %80 = vector.extract_strided_slice %14 {offsets = [0, 16], sizes = [32, 8], strides = [1, 1]} : vector<32x32xf32> to vector<32x8xf32>
    %81 = vector.shape_cast %80 : vector<32x8xf32> to vector<2x16x8xf32>
    %82 = arith.truncf %81 : vector<2x16x8xf32> to vector<2x16x8xbf16>
    %83 = vector.extract_strided_slice %19 {offsets = [0, 16], sizes = [32, 8], strides = [1, 1]} : vector<32x32xf32> to vector<32x8xf32>
    %84 = vector.shape_cast %83 : vector<32x8xf32> to vector<2x16x8xf32>
    %85 = arith.truncf %84 : vector<2x16x8xf32> to vector<2x16x8xbf16>
    "tpu.trace_start"() <{level = 10 : i32, message = "btd,bsd->bts"}> : () -> ()
    %cst_27 = arith.constant dense<0.000000e+00> : vector<2x16x16xf32>
    %86 = tpu.matmul %79, %82, %cst_27 {dimension_numbers = #tpu.dot_dimension_numbers<[2], [2], [1], [1], [0, 0, 0, 1, 1, 1], [0], [0]>} : vector<2x16x8xbf16>, vector<2x16x8xbf16>, vector<2x16x16xf32> -> vector<2x16x16xf32>
    %cst_28 = arith.constant -1.000000e+30 : f32
    "tpu.trace_stop"() : () -> ()
    %87 = vector.shape_cast %22 : vector<1x1x16xi1> to vector<1x1x16xi1>
    %88 = vector.broadcast %87 : vector<1x1x16xi1> to vector<2x16x16xi1>
    %89 = vector.broadcast %cst_28 : f32 to vector<2x16x16xf32>
    %90 = arith.select %88, %86, %89 : vector<2x16x16xi1>, vector<2x16x16xf32>
    %cst_29 = arith.constant dense<0xFF800000> : vector<2x16xf32>
    %91 = vector.multi_reduction <maximumf>, %90, %cst_29 [2] : vector<2x16x16xf32> to vector<2x16xf32>
    %92 = vector.shape_cast %91 : vector<2x16xf32> to vector<2x16x1xf32>
    %93 = vector.broadcast %92 : vector<2x16x1xf32> to vector<2x16x16xf32>
    %94 = arith.subf %90, %93 : vector<2x16x16xf32>
    %95 = math.exp %94 : vector<2x16x16xf32>
    %cst_30 = arith.constant dense<0.000000e+00> : vector<2x16xf32>
    %96 = vector.multi_reduction <add>, %95, %cst_30 [2] : vector<2x16x16xf32> to vector<2x16xf32>
    %97 = vector.shape_cast %96 : vector<2x16xf32> to vector<2x16x1xf32>
    %98 = tpu.reciprocal %97 {approx = true} : vector<2x16x1xf32> -> vector<2x16x1xf32>
    %99 = vector.broadcast %98 : vector<2x16x1xf32> to vector<2x16x16xf32>
    %100 = arith.mulf %95, %99 : vector<2x16x16xf32>
    %101 = arith.truncf %100 : vector<2x16x16xf32> to vector<2x16x16xbf16>
    "tpu.trace_start"() <{level = 10 : i32, message = "bts,bsd->btd"}> : () -> ()
    %cst_31 = arith.constant dense<0.000000e+00> : vector<2x16x8xf32>
    %102 = tpu.matmul %101, %85, %cst_31 {dimension_numbers = #tpu.dot_dimension_numbers<[2], [1], [1], [2], [0, 0, 0, 1, 1, 2], [0], [0]>} : vector<2x16x16xbf16>, vector<2x16x8xbf16>, vector<2x16x8xf32> -> vector<2x16x8xf32>
    "tpu.trace_stop"() : () -> ()
    %103 = vector.shape_cast %102 : vector<2x16x8xf32> to vector<32x8xf32>
    %104 = vector.extract_strided_slice %9 {offsets = [0, 24], sizes = [32, 8], strides = [1, 1]} : vector<32x32xf32> to vector<32x8xf32>
    %105 = vector.shape_cast %104 : vector<32x8xf32> to vector<2x16x8xf32>
    %106 = arith.truncf %105 : vector<2x16x8xf32> to vector<2x16x8xbf16>
    %107 = vector.extract_strided_slice %14 {offsets = [0, 24], sizes = [32, 8], strides = [1, 1]} : vector<32x32xf32> to vector<32x8xf32>
    %108 = vector.shape_cast %107 : vector<32x8xf32> to vector<2x16x8xf32>
    %109 = arith.truncf %108 : vector<2x16x8xf32> to vector<2x16x8xbf16>
    %110 = vector.extract_strided_slice %19 {offsets = [0, 24], sizes = [32, 8], strides = [1, 1]} : vector<32x32xf32> to vector<32x8xf32>
    %111 = vector.shape_cast %110 : vector<32x8xf32> to vector<2x16x8xf32>
    %112 = arith.truncf %111 : vector<2x16x8xf32> to vector<2x16x8xbf16>
    "tpu.trace_start"() <{level = 10 : i32, message = "btd,bsd->bts"}> : () -> ()
    %cst_32 = arith.constant dense<0.000000e+00> : vector<2x16x16xf32>
    %113 = tpu.matmul %106, %109, %cst_32 {dimension_numbers = #tpu.dot_dimension_numbers<[2], [2], [1], [1], [0, 0, 0, 1, 1, 1], [0], [0]>} : vector<2x16x8xbf16>, vector<2x16x8xbf16>, vector<2x16x16xf32> -> vector<2x16x16xf32>
    %cst_33 = arith.constant -1.000000e+30 : f32
    "tpu.trace_stop"() : () -> ()
    %114 = vector.shape_cast %22 : vector<1x1x16xi1> to vector<1x1x16xi1>
    %115 = vector.broadcast %114 : vector<1x1x16xi1> to vector<2x16x16xi1>
    %116 = vector.broadcast %cst_33 : f32 to vector<2x16x16xf32>
    %117 = arith.select %115, %113, %116 : vector<2x16x16xi1>, vector<2x16x16xf32>
    %cst_34 = arith.constant dense<0xFF800000> : vector<2x16xf32>
    %118 = vector.multi_reduction <maximumf>, %117, %cst_34 [2] : vector<2x16x16xf32> to vector<2x16xf32>
    %119 = vector.shape_cast %118 : vector<2x16xf32> to vector<2x16x1xf32>
    %120 = vector.broadcast %119 : vector<2x16x1xf32> to vector<2x16x16xf32>
    %121 = arith.subf %117, %120 : vector<2x16x16xf32>
    %122 = math.exp %121 : vector<2x16x16xf32>
    %cst_35 = arith.constant dense<0.000000e+00> : vector<2x16xf32>
    %123 = vector.multi_reduction <add>, %122, %cst_35 [2] : vector<2x16x16xf32> to vector<2x16xf32>
    %124 = vector.shape_cast %123 : vector<2x16xf32> to vector<2x16x1xf32>
    %125 = tpu.reciprocal %124 {approx = true} : vector<2x16x1xf32> -> vector<2x16x1xf32>
    %126 = vector.broadcast %125 : vector<2x16x1xf32> to vector<2x16x16xf32>
    %127 = arith.mulf %122, %126 : vector<2x16x16xf32>
    %128 = arith.truncf %127 : vector<2x16x16xf32> to vector<2x16x16xbf16>
    "tpu.trace_start"() <{level = 10 : i32, message = "bts,bsd->btd"}> : () -> ()
    %cst_36 = arith.constant dense<0.000000e+00> : vector<2x16x8xf32>
    %129 = tpu.matmul %128, %112, %cst_36 {dimension_numbers = #tpu.dot_dimension_numbers<[2], [1], [1], [2], [0, 0, 0, 1, 1, 2], [0], [0]>} : vector<2x16x16xbf16>, vector<2x16x8xbf16>, vector<2x16x8xf32> -> vector<2x16x8xf32>
    "tpu.trace_stop"() : () -> ()
    %130 = vector.shape_cast %129 : vector<2x16x8xf32> to vector<32x8xf32>
    %131 = tpu.concatenate %49, %76, %103, %130 in 1 : vector<32x8xf32>, vector<32x8xf32>, vector<32x8xf32>, vector<32x8xf32> -> vector<32x32xf32>
    %132 = arith.truncf %131 : vector<32x32xf32> to vector<32x32xbf16>
    %c0_37 = arith.constant 0 : index
    %c0_38 = arith.constant 0 : index
    %133 = vector.load %arg8[%c0_37, %c0_38] : memref<32x32xbf16, #tpu.memory_space<vmem>>, vector<32x32xbf16>
    %cst_39 = arith.constant dense<0.000000e+00> : vector<32x32xf32>
    %134 = tpu.matmul %132, %133, %cst_39 {dimension_numbers = #tpu.dot_dimension_numbers<[1], [0], [0], [1], [0, 0, 1, 1], [], []>} : vector<32x32xbf16>, vector<32x32xbf16>, vector<32x32xf32> -> vector<32x32xf32>
    %c0_40 = arith.constant 0 : index
    %c0_41 = arith.constant 0 : index
    %135 = vector.load %arg9[%c0_40, %c0_41] : memref<1x32xf32, #tpu.memory_space<vmem>>, vector<1x32xf32>
    %136 = vector.broadcast %135 : vector<1x32xf32> to vector<32x32xf32>
    %137 = arith.addf %134, %136 : vector<32x32xf32>
    %138 = arith.addf %1, %137 : vector<32x32xf32>
    %c0_42 = arith.constant 0 : index
    %c0_43 = arith.constant 0 : index
    %139 = vector.load %arg10[%c0_42, %c0_43] : memref<1x32xf32, #tpu.memory_space<vmem>>, vector<1x32xf32>
    %c0_44 = arith.constant 0 : index
    %c0_45 = arith.constant 0 : index
    %140 = vector.load %arg11[%c0_44, %c0_45] : memref<1x32xf32, #tpu.memory_space<vmem>>, vector<1x32xf32>
    %cst_46 = arith.constant dense<0.000000e+00> : vector<32xf32>
    %141 = vector.multi_reduction <add>, %138, %cst_46 [1] : vector<32x32xf32> to vector<32xf32>
    %142 = vector.shape_cast %141 : vector<32xf32> to vector<32x1xf32>
    %cst_47 = arith.constant 3.200000e+01 : f32
    %143 = vector.broadcast %cst_47 : f32 to vector<32x1xf32>
    %144 = arith.divf %142, %143 : vector<32x1xf32>
    %145 = arith.mulf %138, %138 : vector<32x32xf32>
    %cst_48 = arith.constant dense<0.000000e+00> : vector<32xf32>
    %146 = vector.multi_reduction <add>, %145, %cst_48 [1] : vector<32x32xf32> to vector<32xf32>
    %147 = vector.shape_cast %146 : vector<32xf32> to vector<32x1xf32>
    %cst_49 = arith.constant 3.200000e+01 : f32
    %148 = vector.broadcast %cst_49 : f32 to vector<32x1xf32>
    %149 = arith.divf %147, %148 : vector<32x1xf32>
    %150 = arith.mulf %144, %144 : vector<32x1xf32>
    %151 = arith.subf %149, %150 : vector<32x1xf32>
    %cst_50 = arith.constant 0.000000e+00 : f32
    %152 = vector.broadcast %cst_50 : f32 to vector<32x1xf32>
    %153 = arith.maximumf %151, %152 : vector<32x1xf32>
    %154 = vector.broadcast %144 : vector<32x1xf32> to vector<32x32xf32>
    %155 = arith.subf %138, %154 : vector<32x32xf32>
    %cst_51 = arith.constant 9.99999974E-6 : f32
    %156 = vector.broadcast %cst_51 : f32 to vector<32x1xf32>
    %157 = arith.addf %153, %156 : vector<32x1xf32>
    %158 = math.rsqrt %157 : vector<32x1xf32>
    %159 = vector.broadcast %158 : vector<32x1xf32> to vector<32x32xf32>
    %160 = arith.mulf %155, %159 : vector<32x32xf32>
    %161 = vector.broadcast %139 : vector<1x32xf32> to vector<32x32xf32>
    %162 = arith.mulf %160, %161 : vector<32x32xf32>
    %163 = vector.broadcast %140 : vector<1x32xf32> to vector<32x32xf32>
    %164 = arith.addf %162, %163 : vector<32x32xf32>
    %165 = arith.truncf %164 : vector<32x32xf32> to vector<32x32xbf16>
    %c0_52 = arith.constant 0 : index
    %c0_53 = arith.constant 0 : index
    %166 = vector.load %arg12[%c0_52, %c0_53] : memref<32x64xbf16, #tpu.memory_space<vmem>>, vector<32x64xbf16>
    %cst_54 = arith.constant dense<0.000000e+00> : vector<32x64xf32>
    %167 = tpu.matmul %165, %166, %cst_54 {dimension_numbers = #tpu.dot_dimension_numbers<[1], [0], [0], [1], [0, 0, 1, 1], [], []>} : vector<32x32xbf16>, vector<32x64xbf16>, vector<32x64xf32> -> vector<32x64xf32>
    %c0_55 = arith.constant 0 : index
    %c0_56 = arith.constant 0 : index
    %168 = vector.load %arg13[%c0_55, %c0_56] : memref<1x64xf32, #tpu.memory_space<vmem>>, vector<1x64xf32>
    %169 = vector.broadcast %168 : vector<1x64xf32> to vector<32x64xf32>
    %170 = arith.addf %167, %169 : vector<32x64xf32>
    %cst_57 = arith.constant 5.000000e-01 : f32
    %171 = vector.broadcast %cst_57 : f32 to vector<32x64xf32>
    %172 = arith.mulf %171, %170 : vector<32x64xf32>
    %cst_58 = arith.constant 4.471500e-02 : f32
    %173 = vector.broadcast %cst_58 : f32 to vector<32x64xf32>
    %174 = arith.mulf %173, %170 : vector<32x64xf32>
    %175 = arith.mulf %174, %170 : vector<32x64xf32>
    %176 = arith.mulf %175, %170 : vector<32x64xf32>
    %177 = arith.addf %170, %176 : vector<32x64xf32>
    %cst_59 = arith.constant 0.797884583 : f32
    %178 = vector.broadcast %cst_59 : f32 to vector<32x64xf32>
    %179 = arith.mulf %178, %177 : vector<32x64xf32>
    %180 = math.tanh %179 : vector<32x64xf32>
    %cst_60 = arith.constant 1.000000e+00 : f32
    %181 = vector.broadcast %cst_60 : f32 to vector<32x64xf32>
    %182 = arith.addf %181, %180 : vector<32x64xf32>
    %183 = arith.mulf %172, %182 : vector<32x64xf32>
    %184 = arith.truncf %183 : vector<32x64xf32> to vector<32x64xbf16>
    %c0_61 = arith.constant 0 : index
    %c0_62 = arith.constant 0 : index
    %185 = vector.load %arg14[%c0_61, %c0_62] : memref<64x32xbf16, #tpu.memory_space<vmem>>, vector<64x32xbf16>
    %cst_63 = arith.constant dense<0.000000e+00> : vector<32x32xf32>
    %186 = tpu.matmul %184, %185, %cst_63 {dimension_numbers = #tpu.dot_dimension_numbers<[1], [0], [0], [1], [0, 0, 1, 1], [], []>} : vector<32x64xbf16>, vector<64x32xbf16>, vector<32x32xf32> -> vector<32x32xf32>
    %c0_64 = arith.constant 0 : index
    %c0_65 = arith.constant 0 : index
    %187 = vector.load %arg15[%c0_64, %c0_65] : memref<1x32xf32, #tpu.memory_space<vmem>>, vector<1x32xf32>
    %188 = vector.broadcast %187 : vector<1x32xf32> to vector<32x32xf32>
    %189 = arith.addf %186, %188 : vector<32x32xf32>
    %190 = arith.addf %164, %189 : vector<32x32xf32>
    %c0_66 = arith.constant 0 : index
    %c0_67 = arith.constant 0 : index
    %191 = vector.load %arg16[%c0_66, %c0_67] : memref<1x32xf32, #tpu.memory_space<vmem>>, vector<1x32xf32>
    %c0_68 = arith.constant 0 : index
    %c0_69 = arith.constant 0 : index
    %192 = vector.load %arg17[%c0_68, %c0_69] : memref<1x32xf32, #tpu.memory_space<vmem>>, vector<1x32xf32>
    %cst_70 = arith.constant dense<0.000000e+00> : vector<32xf32>
    %193 = vector.multi_reduction <add>, %190, %cst_70 [1] : vector<32x32xf32> to vector<32xf32>
    %194 = vector.shape_cast %193 : vector<32xf32> to vector<32x1xf32>
    %cst_71 = arith.constant 3.200000e+01 : f32
    %195 = vector.broadcast %cst_71 : f32 to vector<32x1xf32>
    %196 = arith.divf %194, %195 : vector<32x1xf32>
    %197 = arith.mulf %190, %190 : vector<32x32xf32>
    %cst_72 = arith.constant dense<0.000000e+00> : vector<32xf32>
    %198 = vector.multi_reduction <add>, %197, %cst_72 [1] : vector<32x32xf32> to vector<32xf32>
    %199 = vector.shape_cast %198 : vector<32xf32> to vector<32x1xf32>
    %cst_73 = arith.constant 3.200000e+01 : f32
    %200 = vector.broadcast %cst_73 : f32 to vector<32x1xf32>
    %201 = arith.divf %199, %200 : vector<32x1xf32>
    %202 = arith.mulf %196, %196 : vector<32x1xf32>
    %203 = arith.subf %201, %202 : vector<32x1xf32>
    %cst_74 = arith.constant 0.000000e+00 : f32
    %204 = vector.broadcast %cst_74 : f32 to vector<32x1xf32>
    %205 = arith.maximumf %203, %204 : vector<32x1xf32>
    %206 = vector.broadcast %196 : vector<32x1xf32> to vector<32x32xf32>
    %207 = arith.subf %190, %206 : vector<32x32xf32>
    %cst_75 = arith.constant 9.99999974E-6 : f32
    %208 = vector.broadcast %cst_75 : f32 to vector<32x1xf32>
    %209 = arith.addf %205, %208 : vector<32x1xf32>
    %210 = math.rsqrt %209 : vector<32x1xf32>
    %211 = vector.broadcast %210 : vector<32x1xf32> to vector<32x32xf32>
    %212 = arith.mulf %207, %211 : vector<32x32xf32>
    %213 = vector.broadcast %191 : vector<1x32xf32> to vector<32x32xf32>
    %214 = arith.mulf %212, %213 : vector<32x32xf32>
    %215 = vector.broadcast %192 : vector<1x32xf32> to vector<32x32xf32>
    %216 = arith.addf %214, %215 : vector<32x32xf32>
    %217 = vector.shape_cast %216 : vector<32x32xf32> to vector<2x16x32xf32>
    %c0_76 = arith.constant 0 : index
    %c0_77 = arith.constant 0 : index
    %c0_78 = arith.constant 0 : index
    %218 = vector.load %arg18[%c0_76, %c0_77, %c0_78] : memref<2x16x32xf32, #tpu.memory_space<vmem>>, vector<2x16x32xf32>
    tpu.vector_store %arg18[%c0_76, %c0_77, %c0_78], %217 {strides = array<i32>} : memref<2x16x32xf32, #tpu.memory_space<vmem>>, vector<2x16x32xf32>,
    return
  }
  func.func @transform_0(%arg0: i32) -> (i32, i32, i32) {
    %c0_i32 = arith.constant 0 : i32
    %c0_i32_0 = arith.constant 0 : i32
    %c0_i32_1 = arith.constant 0 : i32
    return %arg0, %c0_i32, %c0_i32_0 : i32, i32, i32
  }
  func.func @transform_1(%arg0: i32) -> (i32, i32) {
    %c0_i32 = arith.constant 0 : i32
    %c0_i32_0 = arith.constant 0 : i32
    %c0_i32_1 = arith.constant 0 : i32
    return %c0_i32, %c0_i32_0 : i32, i32
  }
  func.func @transform_2(%arg0: i32) -> (i32, i32) {
    %c0_i32 = arith.constant 0 : i32
    %c0_i32_0 = arith.constant 0 : i32
    %c0_i32_1 = arith.constant 0 : i32
    return %c0_i32, %c0_i32_0 : i32, i32
  }
  func.func @transform_3(%arg0: i32) -> (i32, i32) {
    %c0_i32 = arith.constant 0 : i32
    %c0_i32_0 = arith.constant 0 : i32
    %c0_i32_1 = arith.constant 0 : i32
    return %c0_i32, %c0_i32_0 : i32, i32
  }
  func.func @transform_4(%arg0: i32) -> (i32, i32) {
    %c0_i32 = arith.constant 0 : i32
    %c0_i32_0 = arith.constant 0 : i32
    %c0_i32_1 = arith.constant 0 : i32
    return %c0_i32, %c0_i32_0 : i32, i32
  }
  func.func @transform_5(%arg0: i32) -> (i32, i32) {
    %c0_i32 = arith.constant 0 : i32
    %c0_i32_0 = arith.constant 0 : i32
    %c0_i32_1 = arith.constant 0 : i32
    return %c0_i32, %c0_i32_0 : i32, i32
  }
  func.func @transform_6(%arg0: i32) -> (i32, i32) {
    %c0_i32 = arith.constant 0 : i32
    %c0_i32_0 = arith.constant 0 : i32
    %c0_i32_1 = arith.constant 0 : i32
    return %c0_i32, %c0_i32_0 : i32, i32
  }
  func.func @transform_7(%arg0: i32) -> (i32, i32) {
    %c0_i32 = arith.constant 0 : i32
    %c0_i32_0 = arith.constant 0 : i32
    %c0_i32_1 = arith.constant 0 : i32
    return %c0_i32, %c0_i32_0 : i32, i32
  }
  func.func @transform_8(%arg0: i32) -> (i32, i32) {
    %c0_i32 = arith.constant 0 : i32
    %c0_i32_0 = arith.constant 0 : i32
    %c0_i32_1 = arith.constant 0 : i32
    return %c0_i32, %c0_i32_0 : i32, i32
  }
  func.func @transform_9(%arg0: i32) -> (i32, i32) {
    %c0_i32 = arith.constant 0 : i32
    %c0_i32_0 = arith.constant 0 : i32
    %c0_i32_1 = arith.constant 0 : i32
    return %c0_i32, %c0_i32_0 : i32, i32
  }
  func.func @transform_10(%arg0: i32) -> (i32, i32) {
    %c0_i32 = arith.constant 0 : i32
    %c0_i32_0 = arith.constant 0 : i32
    %c0_i32_1 = arith.constant 0 : i32
    return %c0_i32, %c0_i32_0 : i32, i32
  }
  func.func @transform_11(%arg0: i32) -> (i32, i32) {
    %c0_i32 = arith.constant 0 : i32
    %c0_i32_0 = arith.constant 0 : i32
    %c0_i32_1 = arith.constant 0 : i32
    return %c0_i32, %c0_i32_0 : i32, i32
  }
  func.func @transform_12(%arg0: i32) -> (i32, i32) {
    %c0_i32 = arith.constant 0 : i32
    %c0_i32_0 = arith.constant 0 : i32
    %c0_i32_1 = arith.constant 0 : i32
    return %c0_i32, %c0_i32_0 : i32, i32
  }
  func.func @transform_13(%arg0: i32) -> (i32, i32) {
    %c0_i32 = arith.constant 0 : i32
    %c0_i32_0 = arith.constant 0 : i32
    %c0_i32_1 = arith.constant 0 : i32
    return %c0_i32, %c0_i32_0 : i32, i32
  }
  func.func @transform_14(%arg0: i32) -> (i32, i32) {
    %c0_i32 = arith.constant 0 : i32
    %c0_i32_0 = arith.constant 0 : i32
    %c0_i32_1 = arith.constant 0 : i32
    return %c0_i32, %c0_i32_0 : i32, i32
  }
  func.func @transform_15(%arg0: i32) -> (i32, i32) {
    %c0_i32 = arith.constant 0 : i32
    %c0_i32_0 = arith.constant 0 : i32
    %c0_i32_1 = arith.constant 0 : i32
    return %c0_i32, %c0_i32_0 : i32, i32
  }
  func.func @transform_16(%arg0: i32) -> (i32, i32) {
    %c0_i32 = arith.constant 0 : i32
    %c0_i32_0 = arith.constant 0 : i32
    %c0_i32_1 = arith.constant 0 : i32
    return %c0_i32, %c0_i32_0 : i32, i32
  }
  func.func @transform_17(%arg0: i32) -> (i32, i32, i32) {
    %c0_i32 = arith.constant 0 : i32
    %c0_i32_0 = arith.constant 0 : i32
    %c0_i32_1 = arith.constant 0 : i32
    return %arg0, %c0_i32, %c0_i32_0 : i32, i32, i32
  }
}

</mosaic_0001>

<bundles_post_ra>
// kernel: tpu_custom_call.1
= control target key start
LH: loop header
LB: loop body
LE: loop exit
PB: predicated region body
PF: predicated region fallthrough
CT: control target
= control target key end

     0   :  { %s2947_s0 = inlined_call_operand.vmem [shape: f32[2,16,32], index: 0, kind: input, shape index: {}]   ;;  %s2948_s1 = inlined_call_operand.vmem [shape: bf16[32,32], index: 1, kind: input, shape index: {}]   ;;  %s2949_s2 = inlined_call_operand.vmem [shape: f32[1,32], index: 2, kind: input, shape index: {}]   ;;  %s2950_s3 = inlined_call_operand.hbm [shape: bf16[32,32], index: 3, kind: input, shape index: {}]   ;;  %s2951_s4 = inlined_call_operand.vmem [shape: f32[1,32], index: 4, kind: input, shape index: {}]   ;;  %s2952_s5 = inlined_call_operand.hbm [shape: bf16[32,32], index: 5, kind: input, shape index: {}]   ;;  %s2953_s6 = inlined_call_operand.vmem [shape: f32[1,32], index: 6, kind: input, shape index: {}]   ;;  %s2954_s7 = inlined_call_operand.hbm [shape: bf16[32,32], index: 7, kind: input, shape index: {}]   ;;  %s2955_s8 = inlined_call_operand.vmem [shape: f32[1,32], index: 8, kind: input, shape index: {}]   ;;  %s2956_s9 = inlined_call_operand.vmem [shape: f32[1,32], index: 9, kind: input, shape index: {}]   ;;  %s2957_s10 = inlined_call_operand.vmem [shape: f32[1,32], index: 10, kind: input, shape index: {}]   ;;  %s2958_s11 = inlined_call_operand.hbm [shape: bf16[32,64], index: 11, kind: input, shape index: {}]   ;;  %s2959_s12 = inlined_call_operand.vmem [shape: f32[1,64], index: 12, kind: input, shape index: {}]   ;;  %s2960_s13 = inlined_call_operand.vmem [shape: bf16[64,32], index: 13, kind: input, shape index: {}]   ;;  %s2961_s14 = inlined_call_operand.vmem [shape: f32[1,32], index: 14, kind: input, shape index: {}]   ;;  %s2962_s15 = inlined_call_operand.vmem [shape: f32[1,32], index: 15, kind: input, shape index: {}]   ;;  %s2963_s16 = inlined_call_operand.vmem [shape: f32[1,32], index: 16, kind: input, shape index: {}]   ;;  %s2964_s17 = inlined_call_operand.hbm [shape: f32[2,16,32], index: 17, kind: output, shape index: {}]  }
   0x1   :  { %2967 = sst [smem:[#allocation15_spill]] %s2947_s0 }
   0x2   :  { %2968 = sst [smem:[#allocation16_spill]] %s2948_s1 }
   0x3   :  { %22 = vsyncpa [#allocation3], 0 }
   0x4   :  { %23 = vsyncpa [#allocation6], 0 }
   0x5   :  { %24 = vsyncpa [#allocation9], 0 }
   0x6   :  { %25 = vsyncpa [#allocation4], 0  ;;  %s2411_s24 = smov [#allocation5]   ;;  %s2412_s26 = smov [#allocation2]  }
   0x7   :  { %s51_s25 = sshll.u32 %s2411_s24, 4  ;;  %s37_s27 = sshll.u32 %s2412_s26, 4  ;;  %s52_s25 = int_to_ptr.vmem [resolvable:$true] %s51_s25  ;;  %s38_s27 = int_to_ptr.vmem [resolvable:$true] %s37_s27 }
   0x8   :  { %s2311_s28 = scalar_lea.vmem %s52_s25, 256  ;;  %p2316_p1 = scmp.lt.s32.totalorder %s52_s25, %s52_s25 }
   0x9   :  { %p2312_p0 = scmp.ne.s32.totalorder %s52_s25, %s2311_s28  ;;  %p2317_p2 = scmp.lt.s32.totalorder %s2311_s28, %s2311_s28 }
   0xb   :  { %p2318_p3 = por %p2317_p2, %p2316_p1 }
   0xd   :  { %p2319_p4 = pnand %p2318_p3, %p2312_p0 }
   0xf   :  { %2322 = shalt.err (!%p2319_p4)
}
  0x10   :  { %s2413_s29 = smov 64   ;;  %s2414_s0 = smov 4  }
  0x11   :  { %57 = dma.hbm_to_vmem [thread:$0]  %s2952_s5, 256, %s52_s25, [#allocation6], %s2413_s29, %s2413_s29, %s2414_s0  }
  0x12   :  { %s2331_s19 = scalar_lea.vmem %s38_s27, 256  ;;  %p2336_p6 = scmp.lt.s32.totalorder %s38_s27, %s38_s27 }
  0x13   :  { %p2332_p5 = scmp.ne.s32.totalorder %s38_s27, %s2331_s19  ;;  %p2337_p7 = scmp.lt.s32.totalorder %s2331_s19, %s2331_s19 }
  0x15   :  { %p2338_p8 = por %p2337_p7, %p2336_p6 }
  0x17   :  { %p2339_p9 = pnand %p2338_p8, %p2332_p5 }
  0x19   :  { %2342 = shalt.err (!%p2339_p9)
}
  0x1a   :  { %43 = dma.hbm_to_vmem [thread:$0]  %s2950_s3, 256, %s38_s27, [#allocation3], %s2413_s29, %s2413_s29, %s2414_s0  }
  0x1b   :  { %s2415_s21 = smov [#allocation7]   ;;  %s2416_s23 = smov [#allocation8]  }
  0x1c   :  { %s65_s22 = sshll.u32 %s2415_s21, 4  ;;  %s83_s24 = sshll.u32 %s2416_s23, 4  ;;  %s66_s22 = int_to_ptr.vmem [resolvable:$true] %s65_s22  ;;  %s84_s24 = int_to_ptr.vmem [resolvable:$true] %s83_s24 }
  0x1d   :  { %s2351_s5 = scalar_lea.vmem %s66_s22, 256  ;;  %p2356_p11 = scmp.lt.s32.totalorder %s66_s22, %s66_s22 }
  0x1e   :  { %p2352_p10 = scmp.ne.s32.totalorder %s66_s22, %s2351_s5  ;;  %p2357_p12 = scmp.lt.s32.totalorder %s2351_s5, %s2351_s5 }
  0x20   :  { %p2358_p13 = por %p2357_p12, %p2356_p11 }
  0x22   :  { %p2359_p0 = pnand %p2358_p13, %p2352_p10 }
  0x24   :  { %2362 = shalt.err (!%p2359_p0)
}
  0x25   :  { %71 = dma.hbm_to_vmem [thread:$0]  %s2954_s7, 256, %s66_s22, [#allocation6], %s2413_s29, %s2413_s29, %s2414_s0  }
  0x26   :  { %s2371_s3 = scalar_lea.vmem %s84_s24, 256  ;;  %p2376_p2 = scmp.lt.s32.totalorder %s84_s24, %s84_s24 }
  0x27   :  { %p2372_p1 = scmp.ne.s32.totalorder %s84_s24, %s2371_s3  ;;  %p2377_p3 = scmp.lt.s32.totalorder %s2371_s3, %s2371_s3 }
  0x29   :  { %p2378_p4 = por %p2377_p3, %p2376_p2 }
  0x2b   :  { %p2379_p5 = pnand %p2378_p4, %p2372_p1 }
  0x2d   :  { %2382 = shalt.err (!%p2379_p5)
}
  0x2e   :  { %89 = dma.hbm_to_vmem [thread:$0]  %s2958_s11, 256, %s84_s24, [#allocation9], %s2413_s29, %s2413_s29, %s2414_s0  }
  0x2f   :  { %2403 = dma.done.wait [#allocation3], 256  }
  0x30   :  { %2404 = vsyncadd [#allocation3], 4294967040 }
  0x31   :  { %2405 = dma.done.wait [#allocation6], 512  }
  0x32   :  { %2406 = vsyncadd [#allocation6], 4294966784 }
  0x33   :  { %2407 = dma.done.wait [#allocation9], 256  }
  0x34   :  { %2408 = vsyncadd [#allocation9], 4294967040  ;;  %v2197_v0 = vld [vmem:[#allocation2 + $0x8] sm:$0xff]   ;;  %s2969_s18 = sld [smem:[#allocation16_spill]]  ;;  %v2199_v2 = vld [vmem:[#allocation2] sm:$0xff]   ;;  %vm142_vm0 = vcmask 261120   ;;  %v346_v52 = vlaneseq }
  0x35   :  { %2011 = vmatprep.subr.bf16.mxu1 %v2197_v0  ;;  %s2970_s0 = sld [smem:[#allocation15_spill]]  ;;  %v2201_v10 = vld [vmem:[#allocation5 + $0x8] sm:$0xff]   ;;  %v2202_v11 = vld [vmem:[#allocation5] sm:$0xff]   ;;  %v2417_v12 = vmov 0.0   ;;  %vm2418_vm1 = vmmov 0   ;;  %vm355_vm2 = vcmask 64512  }
  0x36   :  { %2012 = vmatpush3.bf16.msra.mxu1 %v2197_v0  ;;  %v1898_v15 = vld [vmem:[%s2951_s4] ss:$0 sm:$0xff]  ;;  %v2610_v53 = vand.u32 127, %v346_v52  ;;  %vm456_vm4 = vcmask 130048   ;;  %s2420_s28 = smov 112   ;;  %s2421_s7 = smov 104  }
  0x37   :  { %2013 = vmatprep.subr.bf16.mxu1 %v2199_v2  ;;  %v1893_v17 = vld [vmem:[%s2949_s2] ss:$0 sm:$0xff]  ;;  %s2422_s30 = smov 8   ;;  %s2424_s19 = smov 24   ;;  %vm1391_vm5 = vcmask 195584   ;;  %vm1724_vm6 = vcmask 523264  }
  0x38   :  { %v1903_v42 = vld [vmem:[%s2953_s6] ss:$0 sm:$0xff]  ;;  %vm348_vm3 = vcmp.lt.s32.totalorder %v2610_v53, 9  ;;  %s2419_s6 = smov 120  }
  0x3a   :  { %v2198_v1 = vld [vmem:[%s2969_s18 + $0x8] sm:$0xff]   ;;  %v2200_v3 = vld [vmem:[%s2969_s18] sm:$0xff]   ;;  %2014 = vmatpush3.bf16.msra.mxu1 %v2199_v2  ;;  %s2423_s18 = smov 16  }
  0x3b   :  { %2003 = vmatprep.subr.bf16.mxu0 %v2198_v1  ;;  %v113_v4 = vld [vmem:[%s2970_s0] sm:$0xff]  ;;  %v114_v5 = vld [vmem:[%s2970_s0 + $0x8] sm:$0xff]  ;;  %v115_v6 = vld [vmem:[%s2970_s0 + $0x10] sm:$0xff]  ;;  %2027 = vmatprep.subr.bf16.mxu1 %v2417_v12 }
  0x3c   :  { %2004 = vmatpush3.bf16.msra.mxu0 %v2198_v1  ;;  %v117_v7 = vpack.c.bf16 %v114_v5, %v113_v4  ;;  %v116_v8 = vld [vmem:[%s2970_s0 + $0x18] sm:$0xff] }
  0x3d   :  { %2005 = vmatprep.subr.bf16.mxu0 %v2200_v3  ;;  %v118_v9 = vpack.c.bf16 %v116_v8, %v115_v6 }
  0x3e   :  { %2015 = vmatprep.mubr.msk.bf16.mxu1 %vm142_vm0, %v117_v7  ;;  %2007 = vmatprep.mubr.msk.bf16.mxu0 %vm142_vm0, %v117_v7 }
  0x3f   :  { %2016 = vmatmul.mubr.msk.bf16.vlgmr.msra.gmra.mxu1 %vm142_vm0, %v118_v9 }
  0x40   :  { %2006 = vmatpush3.bf16.msra.mxu0 %v2200_v3  ;;  %2029 = vmatprep.mubr.msk.bf16.mxu1 %vm2418_vm1, %v2417_v12 }
  0x41   :  { %2019 = vmatprep.subr.bf16.mxu0 %v2201_v10 }
  0x43   :  { %2008 = vmatmul.mubr.msk.bf16.vlgmr.msra.gmra.mxu0 %vm142_vm0, %v118_v9 }
  0x44   :  { %2020 = vmatpush3.bf16.msra.mxu0 %v2201_v10  ;;  %2023 = vmatprep.mubr.msk.bf16.mxu0 %vm142_vm0, %v117_v7 }
  0x45   :  { %2021 = vmatprep.subr.bf16.mxu0 %v2202_v11 }
  0x48   :  { %2022 = vmatpush3.bf16.msra.mxu0 %v2202_v11 }
  0x49   :  { %2033 = vmatprep.subr.bf16.mxu0 %v2417_v12 }
  0x4b   :  { %2024 = vmatmul.mubr.msk.bf16.vlgmr.msra.gmra.mxu0 %vm142_vm0, %v118_v9 }
  0x4c   :  { %2035 = vmatprep.mubr.msk.bf16.mxu0 %vm2418_vm1, %v2417_v12 }
  0xff   :  { %v2017_v13 = vpop.f32.mrf.mxu1 }
 0x100   :  { %v268_v20 = vadd.f32 %v2017_v13, %v1898_v15 }
 0x101   :  { %v259_v16 = vpop.f32.mrf.mxu1 }
 0x102   :  { %v260_v25 = vadd.f32 %v1898_v15, %v259_v16 }
 0x103   :  { %v2009_v14 = vpop.f32.mrf.mxu0  ;;  %v2018_v19 = vpop.f32.mrf.mxu1 }
 0x104   :  { %v271_v21 = vadd.f32 %v2018_v19, %v1898_v15  ;;  %v192_v23 = vadd.f32 %v2009_v14, %v1893_v17 }
 0x105   :  { %v183_v18 = vpop.f32.mrf.mxu0  ;;  %v262_v24 = vpop.f32.mrf.mxu1 }
 0x106   :  { %v2577_v26 = vpack.c.bf16 %v271_v21, %v268_v20  ;;  %v263_v28 = vadd.f32 %v1898_v15, %v262_v24  ;;  %v184_v30 = vadd.f32 %v1893_v17, %v183_v18  ;;  %v200_v34 = vmul.f32 0.35355338, %v192_v23 }
 0x107   :  { %v2010_v22 = vpop.f32.mrf.mxu0 }
 0x108   :  { %v195_v27 = vadd.f32 %v2010_v22, %v1893_v17  ;;  %v2579_v31 = vpack.c.bf16 %v263_v28, %v260_v25  ;;  %v407_v33 = vsel %vm355_vm2, %v2577_v26, 0  ;;  %v198_v37 = vmul.f32 0.35355338, %v184_v30 }
 0x109   :  { %v186_v29 = vpop.f32.mrf.mxu0  ;;  %2034 = vmatpush3.bf16.xpose.msra.mxu0 %v407_v33 }
 0x10a   :  { %v187_v32 = vadd.f32 %v1893_v17, %v186_v29  ;;  %v201_v35 = vmul.f32 0.35355338, %v195_v27  ;;  %v360_v36 = vsel %vm355_vm2, %v2579_v31, 0  ;;  %2045 = vmatprep.subr.bf16.mxu0 %v2417_v12 }
 0x10b   :  { %2028 = vmatpush3.bf16.xpose.msra.mxu1 %v360_v36  ;;  %v2025_v41 = vpop.f32.mrf.mxu0 }
 0x10c   :  { %v199_v38 = vmul.f32 0.35355338, %v187_v32  ;;  %2039 = vmatprep.subr.bf16.mxu1 %v2417_v12  ;;  %v2587_v39 = vpack.c.bf16 %v201_v35, %v200_v34  ;;  %v340_v44 = vadd.f32 %v2025_v41, %v1903_v42 }
 0x10d   :  { %v331_v43 = vpop.f32.mrf.mxu0 }
 0x10e   :  { %v2589_v40 = vpack.c.bf16 %v199_v38, %v198_v37  ;;  %v332_v46 = vadd.f32 %v1903_v42, %v331_v43 }
 0x10f   :  { %v2026_v45 = vpop.f32.mrf.mxu0 }
 0x110   :  { %2036 = vmatmul.mubr.msk.bf16.vlgmr.msra.gmra.mxu0 %vm355_vm2, %v2587_v39  ;;  %v343_v47 = vadd.f32 %v2026_v45, %v1903_v42 }
 0x111   :  { %2047 = vmatprep.mubr.msk.bf16.mxu0 %vm2418_vm1, %v2417_v12  ;;  %v334_v48 = vpop.f32.mrf.mxu0 }
 0x112   :  { %2030 = vmatmul.mubr.msk.bf16.vlgmr.msra.gmra.mxu1 %vm355_vm2, %v2589_v40  ;;  %v2602_v49 = vpack.c.bf16 %v343_v47, %v340_v44  ;;  %v335_v50 = vadd.f32 %v1903_v42, %v334_v48 }
 0x113   :  { %2041 = vmatprep.mubr.msk.bf16.mxu1 %vm2418_vm1, %v2417_v12 }
 0x114   :  { %v2604_v51 = vpack.c.bf16 %v335_v50, %v332_v46  ;;  %2046 = vmatpush3.bf16.msra.mxu0 %v2602_v49 }
 0x115   :  { %2057 = vmatprep.subr.bf16.mxu0 %v2417_v12 }
 0x116   :  { %2040 = vmatpush3.bf16.msra.mxu1 %v2604_v51 }
 0x117   :  { %2051 = vmatprep.subr.bf16.mxu1 %v2417_v12 }
 0x1d0   :  { %v443_v54 = vpop.f32.mrf.mxu0 }
 0x1d1   :  { %v454_v55 = vsel %vm348_vm3, %v443_v54, -1e+30 }
 0x1d2   :  { %v396_v56 = vpop.f32.mrf.mxu1  ;;  %v2037_v57 = vpop.f32.mrf.mxu0  ;;  %v463_v58 = vsel %vm456_vm4, %v454_v55, -inf }
 0x1d3   :  { %v452_v59 = vsel %vm348_vm3, %v396_v56, -1e+30  ;;  %464 = vmax.xlane.f32.xlu1 %v463_v58 }
 0x1d4   :  { %v2031_v60 = vpop.f32.mrf.mxu1  ;;  %v446_v61 = vpop.f32.mrf.mxu0  ;;  %v457_v62 = vsel %vm456_vm4, %v452_v59, -inf }
 0x1d5   :  { %v455_v63 = vsel %vm348_vm3, %v446_v61, -1e+30  ;;  %458 = vmax.xlane.f32.xlu0 %v457_v62 }
 0x1d6   :  { %v399_v0 = vpop.f32.mrf.mxu1  ;;  %v2038_v1 = vpop.f32.mrf.mxu0  ;;  %v466_v2 = vsel %vm456_vm4, %v455_v63, -inf }
 0x1d7   :  { %v453_v3 = vsel %vm348_vm3, %v399_v0, -1e+30  ;;  %467 = vmax.xlane.f32.xlu1 %v466_v2 }
 0x1d8   :  { %v2032_v4 = vpop.f32.mrf.mxu1  ;;  %v460_v5 = vsel %vm456_vm4, %v453_v3, -inf }
 0x1d9   :  { %461 = vmax.xlane.f32.xlu0 %v460_v5 }
 0x1e8   :  { %648 = vrot.lane.b32.xlu1 %v2577_v26, %s2419_s6 }
 0x25c   :  { %v465_v6 = vpop.xlane.xlu1 %464 }
 0x25d   :  { %v471_v7 = vsub.f32 %v454_v55, %v465_v6 }
 0x25e   :  { %v459_v8 = vpop.xlane.xlu0 %458 }
 0x25f   :  { %v477_v9 = vmul.f32 1.442695, %v471_v7  ;;  %v469_v10 = vsub.f32 %v452_v59, %v459_v8 }
 0x260   :  { %v468_v11 = vpop.xlane.xlu1 %467 }
 0x261   :  { %2211 = vpow2.f32 %v477_v9  ;;  %v473_v13 = vmul.f32 1.442695, %v469_v10  ;;  %v472_v14 = vsub.f32 %v455_v63, %v468_v11 }
 0x262   :  { %v462_v15 = vpop.xlane.xlu0 %461 }
 0x263   :  { %2213 = vpow2.f32 %v473_v13  ;;  %v479_v16 = vmul.f32 1.442695, %v472_v14  ;;  %v470_v17 = vsub.f32 %v453_v3, %v462_v15 }
 0x264   :  { %v649_v28 = vpop.permute.xlu1 %648 }
 0x265   :  { %2215 = vpow2.f32 %v479_v16  ;;  %v475_v18 = vmul.f32 1.442695, %v470_v17  ;;  %v654_v43 = vsel %vm355_vm2, %v649_v28, 0 }
 0x267   :  { %2217 = vpow2.f32 %v475_v18 }
 0x26e   :  { %v2212_v19 = vpop.eup %2211 }
 0x26f   :  { %v487_v20 = vsel %vm456_vm4, %v2212_v19, 0.0 }
 0x270   :  { %v2214_v21 = vpop.eup %2213  ;;  %488 = vadd.xlane.f32.xlu0 %v487_v20 }
 0x271   :  { %v481_v24 = vsel %vm456_vm4, %v2214_v21, 0.0 }
 0x272   :  { %v2216_v22 = vpop.eup %2215 }
 0x273   :  { %v490_v23 = vsel %vm456_vm4, %v2216_v22, 0.0 }
 0x274   :  { %v2218_v25 = vpop.eup %2217  ;;  %491 = vadd.xlane.f32.xlu1 %v490_v23  ;;  %482 = vadd.xlane.f32.xlu0 %v481_v24 }
 0x275   :  { %v484_v27 = vsel %vm456_vm4, %v2218_v25, 0.0 }
 0x278   :  { %485 = vadd.xlane.f32.xlu1 %v484_v27 }
 0x289   :  { %592 = vrot.lane.b32.xlu1 %v2589_v40, %s2419_s6 }
 0x28a   :  { %595 = vrot.lane.b32.xlu0 %v2579_v31, %s2419_s6 }
 0x28d   :  { %645 = vrot.lane.b32.xlu1 %v2587_v39, %s2419_s6 }
 0x2f9   :  { %v489_v29 = vpop.xlane.xlu0 %488 }
 0x2fa   :  { %2219 = vrcp.f32 %v489_v29 }
 0x2fd   :  { %v492_v30 = vpop.xlane.xlu1 %491  ;;  %v483_v32 = vpop.xlane.xlu0 %482 }
 0x2fe   :  { %2221 = vrcp.f32 %v492_v30 }
 0x2ff   :  { %2223 = vrcp.f32 %v483_v32 }
 0x301   :  { %v486_v33 = vpop.xlane.xlu1 %485  ;;  %v596_v46 = vpop.permute.xlu0 %595 }
 0x302   :  { %2225 = vrcp.f32 %v486_v33  ;;  %v601_v50 = vsel %vm355_vm2, %v596_v46, 0 }
 0x305   :  { %v593_v47 = vpop.permute.xlu1 %592 }
 0x307   :  { %v2220_v34 = vpop.eup %2219 }
 0x308   :  { %v499_v36 = vmul.f32 %v2220_v34, %v2212_v19 }
 0x309   :  { %v646_v52 = vpop.permute.xlu1 %645 }
 0x30b   :  { %v2222_v35 = vpop.eup %2221 }
 0x30c   :  { %v500_v37 = vmul.f32 %v2222_v35, %v2216_v22  ;;  %v2224_v38 = vpop.eup %2223 }
 0x30d   :  { %v497_v44 = vmul.f32 %v2224_v38, %v2214_v21 }
 0x30e   :  { %v502_v41 = vpack.c.bf16 %v500_v37, %v499_v36 }
 0x30f   :  { %v2226_v42 = vpop.eup %2225 }
 0x310   :  { %2048 = vmatmul.mubr.msk.bf16.vlgmr.msra.gmra.mxu0 %vm456_vm4, %v502_v41  ;;  %v498_v45 = vmul.f32 %v2226_v42, %v2218_v25 }
 0x311   :  { %2058 = vmatpush3.bf16.xpose.msra.mxu0 %v654_v43  ;;  %2059 = vmatprep.mubr.msk.bf16.mxu0 %vm2418_vm1, %v2417_v12 }
 0x312   :  { %v501_v48 = vpack.c.bf16 %v498_v45, %v497_v44  ;;  %2069 = vmatprep.subr.bf16.mxu0 %v2417_v12 }
 0x314   :  { %2042 = vmatmul.mubr.msk.bf16.vlgmr.msra.gmra.mxu1 %vm456_vm4, %v501_v48 }
 0x315   :  { %2052 = vmatpush3.bf16.xpose.msra.mxu1 %v601_v50  ;;  %2053 = vmatprep.mubr.msk.bf16.mxu1 %vm2418_vm1, %v2417_v12 }
 0x316   :  { %2063 = vmatprep.subr.bf16.mxu1 %v2417_v12 }
 0x318   :  { %2060 = vmatmul.mubr.msk.bf16.vlgmr.msra.gmra.mxu0 %vm355_vm2, %v646_v52 }
 0x319   :  { %2071 = vmatprep.mubr.msk.bf16.mxu0 %vm2418_vm1, %v2417_v12 }
 0x31c   :  { %2054 = vmatmul.mubr.msk.bf16.vlgmr.msra.gmra.mxu1 %vm355_vm2, %v593_v47 }
 0x31d   :  { %2065 = vmatprep.mubr.msk.bf16.mxu1 %vm2418_vm1, %v2417_v12 }
 0x3d0   :  { %v2653_v54 = vpop.f32.mrf.mxu0 }
 0x3d2   :  { %v2049_v55 = vpop.f32.mrf.mxu0 }
 0x3d4   :  { %v2655_v56 = vpop.f32.mrf.mxu1  ;;  %v2657_v57 = vpop.f32.mrf.mxu0 }
 0x3d6   :  { %v2043_v58 = vpop.f32.mrf.mxu1  ;;  %v2050_v59 = vpop.f32.mrf.mxu0 }
 0x3d8   :  { %v2659_v60 = vpop.f32.mrf.mxu1  ;;  %v690_v61 = vpop.f32.mrf.mxu0 }
 0x3d9   :  { %v699_v6 = vsel %vm348_vm3, %v690_v61, -1e+30 }
 0x3da   :  { %v2044_v62 = vpop.f32.mrf.mxu1  ;;  %v2061_v63 = vpop.f32.mrf.mxu0  ;;  %v707_v10 = vsel %vm456_vm4, %v699_v6, -inf }
 0x3dc   :  { %v637_v0 = vpop.f32.mrf.mxu1  ;;  %v693_v1 = vpop.f32.mrf.mxu0 }
 0x3dd   :  { %v697_v2 = vsel %vm348_vm3, %v637_v0, -1e+30  ;;  %v700_v13 = vsel %vm348_vm3, %v693_v1, -1e+30 }
 0x3de   :  { %v2055_v3 = vpop.f32.mrf.mxu1  ;;  %v2062_v4 = vpop.f32.mrf.mxu0  ;;  %v701_v5 = vsel %vm456_vm4, %v697_v2, -inf  ;;  %v710_v14 = vsel %vm456_vm4, %v700_v13, -inf }
 0x3df   :  { %702 = vmax.xlane.f32.xlu0 %v701_v5 }
 0x3e0   :  { %v640_v7 = vpop.f32.mrf.mxu1 }
 0x3e1   :  { %v698_v8 = vsel %vm348_vm3, %v640_v7, -1e+30 }
 0x3e2   :  { %v2056_v9 = vpop.f32.mrf.mxu1  ;;  %v704_v11 = vsel %vm456_vm4, %v698_v8, -inf }
 0x3e3   :  { %708 = vmax.xlane.f32.xlu0 %v707_v10  ;;  %705 = vmax.xlane.f32.xlu1 %v704_v11 }
 0x3e7   :  { %711 = vmax.xlane.f32.xlu0 %v710_v14 }
 0x3f4   :  { %796 = vrot.lane.b32.xlu1 %v2602_v49, %s2419_s6 }
 0x3f8   :  { %845 = vrot.lane.b32.xlu1 %v2579_v31, %s2420_s28 }
 0x468   :  { %v703_v15 = vpop.xlane.xlu0 %702 }
 0x469   :  { %v713_v16 = vsub.f32 %v697_v2, %v703_v15 }
 0x46b   :  { %v717_v20 = vmul.f32 1.442695, %v713_v16 }
 0x46c   :  { %v709_v17 = vpop.xlane.xlu0 %708  ;;  %v706_v18 = vpop.xlane.xlu1 %705 }
 0x46d   :  { %v715_v19 = vsub.f32 %v699_v6, %v709_v17  ;;  %v714_v22 = vsub.f32 %v698_v8, %v706_v18 }
 0x46f   :  { %v721_v21 = vmul.f32 1.442695, %v715_v19  ;;  %v719_v27 = vmul.f32 1.442695, %v714_v22 }
 0x470   :  { %v712_v23 = vpop.xlane.xlu0 %711  ;;  %v797_v24 = vpop.permute.xlu1 %796 }
 0x471   :  { %2227 = vpow2.f32 %v721_v21  ;;  %v716_v25 = vsub.f32 %v700_v13, %v712_v23  ;;  %2070 = vmatpush3.bf16.msra.mxu0 %v797_v24 }
 0x472   :  { %2081 = vmatprep.subr.bf16.mxu0 %v2417_v12  ;;  %2229 = vpow2.f32 %v717_v20 }
 0x473   :  { %v723_v28 = vmul.f32 1.442695, %v716_v25 }
 0x474   :  { %v846_v38 = vpop.permute.xlu1 %845 }
 0x475   :  { %2231 = vpow2.f32 %v723_v28  ;;  %v851_v1 = vsel %vm355_vm2, %v846_v38, 0 }
 0x476   :  { %2233 = vpow2.f32 %v719_v27 }
 0x47e   :  { %v2228_v29 = vpop.eup %2227 }
 0x47f   :  { %v731_v30 = vsel %vm456_vm4, %v2228_v29, 0.0  ;;  %v2230_v32 = vpop.eup %2229 }
 0x480   :  { %732 = vadd.xlane.f32.xlu0 %v731_v30  ;;  %v725_v34 = vsel %vm456_vm4, %v2230_v32, 0.0 }
 0x482   :  { %v2232_v33 = vpop.eup %2231 }
 0x483   :  { %v734_v35 = vsel %vm456_vm4, %v2232_v33, 0.0  ;;  %v2234_v36 = vpop.eup %2233 }
 0x484   :  { %726 = vadd.xlane.f32.xlu0 %v725_v34  ;;  %735 = vadd.xlane.f32.xlu1 %v734_v35  ;;  %v728_v37 = vsel %vm456_vm4, %v2234_v36, 0.0 }
 0x488   :  { %729 = vadd.xlane.f32.xlu1 %v728_v37 }
 0x499   :  { %896 = vrot.lane.b32.xlu1 %v2577_v26, %s2420_s28 }
 0x49a   :  { %748 = vrot.lane.b32.xlu0 %v2604_v51, %s2419_s6 }
 0x49d   :  { %894 = vrot.lane.b32.xlu1 %v2587_v39, %s2420_s28 }
 0x49e   :  { %843 = vrot.lane.b32.xlu0 %v2589_v40, %s2420_s28 }
 0x509   :  { %v733_v41 = vpop.xlane.xlu0 %732 }
 0x50a   :  { %2235 = vrcp.f32 %v733_v41 }
 0x50d   :  { %v727_v42 = vpop.xlane.xlu0 %726  ;;  %v736_v43 = vpop.xlane.xlu1 %735 }
 0x50e   :  { %2237 = vrcp.f32 %v736_v43 }
 0x50f   :  { %2239 = vrcp.f32 %v727_v42 }
 0x511   :  { %v749_v44 = vpop.permute.xlu0 %748  ;;  %v730_v45 = vpop.xlane.xlu1 %729 }
 0x512   :  { %2241 = vrcp.f32 %v730_v45  ;;  %2064 = vmatpush3.bf16.msra.mxu1 %v749_v44 }
 0x513   :  { %2075 = vmatprep.subr.bf16.mxu1 %v2417_v12 }
 0x515   :  { %v897_v55 = vpop.permute.xlu1 %896  ;;  %v844_v3 = vpop.permute.xlu0 %843 }
 0x516   :  { %v902_v63 = vsel %vm355_vm2, %v897_v55, 0 }
 0x517   :  { %v2236_v46 = vpop.eup %2235 }
 0x518   :  { %v743_v50 = vmul.f32 %v2236_v46, %v2228_v29 }
 0x519   :  { %v895_v2 = vpop.permute.xlu1 %894 }
 0x51b   :  { %v2238_v47 = vpop.eup %2237 }
 0x51c   :  { %v2240_v48 = vpop.eup %2239  ;;  %v744_v52 = vmul.f32 %v2238_v47, %v2232_v33 }
 0x51d   :  { %v741_v61 = vmul.f32 %v2240_v48, %v2230_v32 }
 0x51e   :  { %v746_v59 = vpack.c.bf16 %v744_v52, %v743_v50 }
 0x51f   :  { %v2242_v58 = vpop.eup %2241 }
 0x520   :  { %v742_v62 = vmul.f32 %v2242_v58, %v2234_v36  ;;  %2072 = vmatmul.mubr.msk.bf16.vlgmr.msra.gmra.mxu0 %vm456_vm4, %v746_v59 }
 0x521   :  { %2082 = vmatpush3.bf16.xpose.msra.mxu0 %v902_v63  ;;  %2083 = vmatprep.mubr.msk.bf16.mxu0 %vm2418_vm1, %v2417_v12 }
 0x522   :  { %v745_v0 = vpack.c.bf16 %v742_v62, %v741_v61  ;;  %2093 = vmatprep.subr.bf16.mxu0 %v2417_v12 }
 0x524   :  { %2066 = vmatmul.mubr.msk.bf16.vlgmr.msra.gmra.mxu1 %vm456_vm4, %v745_v0 }
 0x525   :  { %2076 = vmatpush3.bf16.xpose.msra.mxu1 %v851_v1  ;;  %2077 = vmatprep.mubr.msk.bf16.mxu1 %vm2418_vm1, %v2417_v12 }
 0x526   :  { %2087 = vmatprep.subr.bf16.mxu1 %v2417_v12 }
 0x528   :  { %2084 = vmatmul.mubr.msk.bf16.vlgmr.msra.gmra.mxu0 %vm355_vm2, %v895_v2 }
 0x529   :  { %2095 = vmatprep.mubr.msk.bf16.mxu0 %vm2418_vm1, %v2417_v12 }
 0x52c   :  { %2078 = vmatmul.mubr.msk.bf16.vlgmr.msra.gmra.mxu1 %vm355_vm2, %v844_v3 }
 0x52d   :  { %2089 = vmatprep.mubr.msk.bf16.mxu1 %vm2418_vm1, %v2417_v12 }
 0x5e0   :  { %v2707_v4 = vpop.f32.mrf.mxu0 }
 0x5e2   :  { %v2073_v5 = vpop.f32.mrf.mxu0 }
 0x5e4   :  { %v2709_v6 = vpop.f32.mrf.mxu1  ;;  %v2711_v7 = vpop.f32.mrf.mxu0 }
 0x5e5   :  { %v2172_v8 = vpack.i.bf16 %v2711_v7, %v2707_v4 }
 0x5e6   :  { %v2067_v9 = vpop.f32.mrf.mxu1  ;;  %v2074_v10 = vpop.f32.mrf.mxu0 }
 0x5e8   :  { %v2715_v11 = vpop.f32.mrf.mxu1  ;;  %v938_v14 = vpop.f32.mrf.mxu0 }
 0x5e9   :  { %v2167_v13 = vpack.i.bf16 %v2715_v11, %v2709_v6  ;;  %v947_v22 = vsel %vm348_vm3, %v938_v14, -1e+30 }
 0x5ea   :  { %v2068_v15 = vpop.f32.mrf.mxu1  ;;  %v2085_v16 = vpop.f32.mrf.mxu0  ;;  %v955_v28 = vsel %vm456_vm4, %v947_v22, -inf }
 0x5ec   :  { %v887_v17 = vpop.f32.mrf.mxu1  ;;  %v941_v19 = vpop.f32.mrf.mxu0 }
 0x5ed   :  { %v945_v18 = vsel %vm348_vm3, %v887_v17, -1e+30  ;;  %v948_v30 = vsel %vm348_vm3, %v941_v19, -1e+30 }
 0x5ee   :  { %v2079_v20 = vpop.f32.mrf.mxu1  ;;  %v949_v21 = vsel %vm456_vm4, %v945_v18, -inf  ;;  %v2086_v23 = vpop.f32.mrf.mxu0  ;;  %v958_v32 = vsel %vm456_vm4, %v948_v30, -inf }
 0x5ef   :  { %950 = vmax.xlane.f32.xlu0 %v949_v21 }
 0x5f0   :  { %v890_v24 = vpop.f32.mrf.mxu1 }
 0x5f1   :  { %v946_v25 = vsel %vm348_vm3, %v890_v24, -1e+30 }
 0x5f2   :  { %v2080_v27 = vpop.f32.mrf.mxu1  ;;  %v952_v29 = vsel %vm456_vm4, %v946_v25, -inf }
 0x5f3   :  { %956 = vmax.xlane.f32.xlu0 %v955_v28  ;;  %953 = vmax.xlane.f32.xlu1 %v952_v29 }
 0x5f7   :  { %959 = vmax.xlane.f32.xlu0 %v958_v32 }
 0x604   :  { %1042 = vrot.lane.b32.xlu1 %v2602_v49, %s2420_s28 }
 0x608   :  { %1091 = vrot.lane.b32.xlu1 %v2579_v31, %s2421_s7 }
 0x678   :  { %v951_v33 = vpop.xlane.xlu0 %950 }
 0x679   :  { %v961_v34 = vsub.f32 %v945_v18, %v951_v33 }
 0x67b   :  { %v965_v38 = vmul.f32 1.442695, %v961_v34 }
 0x67c   :  { %v957_v35 = vpop.xlane.xlu0 %956  ;;  %v954_v36 = vpop.xlane.xlu1 %953 }
 0x67d   :  { %v963_v37 = vsub.f32 %v947_v22, %v957_v35  ;;  %v962_v42 = vsub.f32 %v946_v25, %v954_v36 }
 0x67f   :  { %v969_v41 = vmul.f32 1.442695, %v963_v37  ;;  %v967_v46 = vmul.f32 1.442695, %v962_v42 }
 0x680   :  { %v960_v43 = vpop.xlane.xlu0 %959  ;;  %v1043_v44 = vpop.permute.xlu1 %1042 }
 0x681   :  { %2243 = vpow2.f32 %v969_v41  ;;  %v964_v45 = vsub.f32 %v948_v30, %v960_v43  ;;  %2094 = vmatpush3.bf16.msra.mxu0 %v1043_v44 }
 0x682   :  { %2105 = vmatprep.subr.bf16.mxu0 %v2417_v12  ;;  %2245 = vpow2.f32 %v965_v38 }
 0x683   :  { %v971_v47 = vmul.f32 1.442695, %v964_v45 }
 0x684   :  { %v1092_v62 = vpop.permute.xlu1 %1091 }
 0x685   :  { %2247 = vpow2.f32 %v971_v47  ;;  %v1097_v20 = vsel %vm355_vm2, %v1092_v62, 0 }
 0x686   :  { %2249 = vpow2.f32 %v967_v46 }
 0x68e   :  { %v2244_v31 = vpop.eup %2243 }
 0x68f   :  { %v979_v48 = vsel %vm456_vm4, %v2244_v31, 0.0  ;;  %v2246_v50 = vpop.eup %2245 }
 0x690   :  { %980 = vadd.xlane.f32.xlu0 %v979_v48  ;;  %v973_v55 = vsel %vm456_vm4, %v2246_v50, 0.0 }
 0x692   :  { %v2248_v52 = vpop.eup %2247 }
 0x693   :  { %v982_v58 = vsel %vm456_vm4, %v2248_v52, 0.0  ;;  %v2250_v59 = vpop.eup %2249 }
 0x694   :  { %974 = vadd.xlane.f32.xlu0 %v973_v55  ;;  %983 = vadd.xlane.f32.xlu1 %v982_v58  ;;  %v976_v61 = vsel %vm456_vm4, %v2250_v59, 0.0 }
 0x698   :  { %977 = vadd.xlane.f32.xlu1 %v976_v61 }
 0x6a9   :  { %1142 = vrot.lane.b32.xlu1 %v2577_v26, %s2421_s7 }
 0x6aa   :  { %995 = vrot.lane.b32.xlu0 %v2604_v51, %s2420_s28 }
 0x6ad   :  { %1140 = vrot.lane.b32.xlu1 %v2587_v39, %s2421_s7 }
 0x6ae   :  { %1089 = vrot.lane.b32.xlu0 %v2589_v40, %s2421_s7 }
 0x719   :  { %v981_v63 = vpop.xlane.xlu0 %980 }
 0x71a   :  { %2251 = vrcp.f32 %v981_v63 }
 0x71d   :  { %v975_v0 = vpop.xlane.xlu0 %974  ;;  %v984_v1 = vpop.xlane.xlu1 %983 }
 0x71e   :  { %2253 = vrcp.f32 %v984_v1 }
 0x71f   :  { %2255 = vrcp.f32 %v975_v0 }
 0x721   :  { %v996_v2 = vpop.permute.xlu0 %995  ;;  %v978_v3 = vpop.xlane.xlu1 %977 }
 0x722   :  { %2257 = vrcp.f32 %v978_v3  ;;  %2088 = vmatpush3.bf16.msra.mxu1 %v996_v2 }
 0x723   :  { %2099 = vmatprep.subr.bf16.mxu1 %v2417_v12 }
 0x725   :  { %v1143_v14 = vpop.permute.xlu1 %1142  ;;  %v1090_v22 = vpop.permute.xlu0 %1089 }
 0x726   :  { %v1148_v18 = vsel %vm355_vm2, %v1143_v14, 0 }
 0x727   :  { %v2252_v26 = vpop.eup %2251 }
 0x728   :  { %v991_v39 = vmul.f32 %v2252_v26, %v2244_v31 }
 0x729   :  { %v1141_v21 = vpop.permute.xlu1 %1140 }
 0x72b   :  { %v2254_v5 = vpop.eup %2253 }
 0x72c   :  { %v2256_v9 = vpop.eup %2255  ;;  %v992_v10 = vmul.f32 %v2254_v5, %v2248_v52 }
 0x72d   :  { %v989_v16 = vmul.f32 %v2256_v9, %v2246_v50 }
 0x72e   :  { %v994_v15 = vpack.c.bf16 %v992_v10, %v991_v39 }
 0x72f   :  { %v2258_v40 = vpop.eup %2257 }
 0x730   :  { %v990_v17 = vmul.f32 %v2258_v40, %v2250_v59  ;;  %2096 = vmatmul.mubr.msk.bf16.vlgmr.msra.gmra.mxu0 %vm456_vm4, %v994_v15 }
 0x731   :  { %2106 = vmatpush3.bf16.xpose.msra.mxu0 %v1148_v18  ;;  %2107 = vmatprep.mubr.msk.bf16.mxu0 %vm2418_vm1, %v2417_v12 }
 0x732   :  { %v993_v19 = vpack.c.bf16 %v990_v17, %v989_v16  ;;  %2117 = vmatprep.subr.bf16.mxu0 %v2417_v12 }
 0x734   :  { %2090 = vmatmul.mubr.msk.bf16.vlgmr.msra.gmra.mxu1 %vm456_vm4, %v993_v19 }
 0x735   :  { %2100 = vmatpush3.bf16.xpose.msra.mxu1 %v1097_v20  ;;  %2101 = vmatprep.mubr.msk.bf16.mxu1 %vm2418_vm1, %v2417_v12 }
 0x736   :  { %2111 = vmatprep.subr.bf16.mxu1 %v2417_v12 }
 0x738   :  { %2108 = vmatmul.mubr.msk.bf16.vlgmr.msra.gmra.mxu0 %vm355_vm2, %v1141_v21 }
 0x739   :  { %2119 = vmatprep.mubr.msk.bf16.mxu0 %vm2418_vm1, %v2417_v12 }
 0x73c   :  { %2102 = vmatmul.mubr.msk.bf16.vlgmr.msra.gmra.mxu1 %vm355_vm2, %v1090_v22 }
 0x73d   :  { %2113 = vmatprep.mubr.msk.bf16.mxu1 %vm2418_vm1, %v2417_v12 }
 0x7f0   :  { %v2765_v23 = vpop.f32.mrf.mxu0 }
 0x7f2   :  { %v2097_v24 = vpop.f32.mrf.mxu0 }
 0x7f4   :  { %v1035_v25 = vpop.f32.mrf.mxu1  ;;  %v1085_v27 = vpop.f32.mrf.mxu0 }
 0x7f5   :  { %v2182_v28 = vpack.i.bf16 %v1085_v27, %v2765_v23  ;;  %v2204_v27 = vld [vmem:[#allocation7] sm:$0xff]  }
 0x7f6   :  { %v2091_v29 = vpop.f32.mrf.mxu1  ;;  %v2098_v30 = vpop.f32.mrf.mxu0 }
 0x7f8   :  { %v1038_v32 = vpop.f32.mrf.mxu1  ;;  %v1184_v34 = vpop.f32.mrf.mxu0 }
 0x7f9   :  { %v2177_v33 = vpack.i.bf16 %v1038_v32, %v1035_v25  ;;  %v1193_v43 = vsel %vm348_vm3, %v1184_v34, -1e+30  ;;  %v2203_v25 = vld [vmem:[#allocation7 + $0x8] sm:$0xff]  }
 0x7fa   :  { %v2092_v35 = vpop.f32.mrf.mxu1  ;;  %v2109_v36 = vpop.f32.mrf.mxu0  ;;  %v1201_v31 = vsel %vm456_vm4, %v1193_v43, -inf }
 0x7fc   :  { %v1133_v37 = vpop.f32.mrf.mxu1  ;;  %v1187_v41 = vpop.f32.mrf.mxu0 }
 0x7fd   :  { %v1191_v38 = vsel %vm348_vm3, %v1133_v37, -1e+30  ;;  %v1194_v50 = vsel %vm348_vm3, %v1187_v41, -1e+30 }
 0x7fe   :  { %v2103_v12 = vpop.f32.mrf.mxu1  ;;  %v1195_v42 = vsel %vm456_vm4, %v1191_v38, -inf  ;;  %v2110_v44 = vpop.f32.mrf.mxu0  ;;  %v1204_v52 = vsel %vm456_vm4, %v1194_v50, -inf }
 0x7ff   :  { %1196 = vmax.xlane.f32.xlu0 %v1195_v42 }
 0x800   :  { %v1136_v45 = vpop.f32.mrf.mxu1 }
 0x801   :  { %v1192_v46 = vsel %vm348_vm3, %v1136_v45, -1e+30 }
 0x802   :  { %v2104_v47 = vpop.f32.mrf.mxu1  ;;  %v1198_v48 = vsel %vm456_vm4, %v1192_v46, -inf }
 0x803   :  { %1202 = vmax.xlane.f32.xlu0 %v1201_v31  ;;  %1199 = vmax.xlane.f32.xlu1 %v1198_v48 }
 0x807   :  { %1205 = vmax.xlane.f32.xlu0 %v1204_v52 }
 0x888   :  { %v1197_v55 = vpop.xlane.xlu0 %1196 }
 0x889   :  { %v1207_v58 = vsub.f32 %v1191_v38, %v1197_v55 }
 0x88b   :  { %v1211_v63 = vmul.f32 1.442695, %v1207_v58 }
 0x88c   :  { %v1203_v59 = vpop.xlane.xlu0 %1202  ;;  %v1200_v61 = vpop.xlane.xlu1 %1199 }
 0x88d   :  { %v1209_v62 = vsub.f32 %v1193_v43, %v1203_v59  ;;  %v1208_v1 = vsub.f32 %v1192_v46, %v1200_v61 }
 0x88f   :  { %v1215_v0 = vmul.f32 1.442695, %v1209_v62  ;;  %v1213_v26 = vmul.f32 1.442695, %v1208_v1 }
 0x890   :  { %v1206_v2 = vpop.xlane.xlu0 %1205 }
 0x891   :  { %2259 = vpow2.f32 %v1215_v0  ;;  %v1210_v3 = vsub.f32 %v1194_v50, %v1206_v2 }
 0x892   :  { %2261 = vpow2.f32 %v1211_v63 }
 0x893   :  { %v1217_v53 = vmul.f32 1.442695, %v1210_v3 }
 0x895   :  { %2263 = vpow2.f32 %v1217_v53 }
 0x896   :  { %2265 = vpow2.f32 %v1213_v26 }
 0x89e   :  { %v2260_v5 = vpop.eup %2259 }
 0x89f   :  { %v1225_v9 = vsel %vm456_vm4, %v2260_v5, 0.0  ;;  %v2262_v39 = vpop.eup %2261 }
 0x8a0   :  { %1226 = vadd.xlane.f32.xlu0 %v1225_v9  ;;  %v1219_v14 = vsel %vm456_vm4, %v2262_v39, 0.0 }
 0x8a2   :  { %v2264_v10 = vpop.eup %2263 }
 0x8a3   :  { %v1228_v40 = vsel %vm456_vm4, %v2264_v10, 0.0  ;;  %v2266_v15 = vpop.eup %2265 }
 0x8a4   :  { %1220 = vadd.xlane.f32.xlu0 %v1219_v14  ;;  %1229 = vadd.xlane.f32.xlu1 %v1228_v40  ;;  %v1222_v16 = vsel %vm456_vm4, %v2266_v15, 0.0 }
 0x8a8   :  { %1223 = vadd.xlane.f32.xlu1 %v1222_v16 }
 0x8b9   :  { %1288 = vrot.lane.b32.xlu1 %v2602_v49, %s2421_s7 }
 0x8ba   :  { %1241 = vrot.lane.b32.xlu0 %v2604_v51, %s2421_s7 }
 0x8bd   :  { %2168 = vrot.lane.b32.xlu1 %v2167_v13, %s2422_s30 }
 0x8be   :  { %2178 = vrot.lane.b32.xlu0 %v2177_v33, %s2423_s18 }
 0x8c1   :  { %2173 = vrot.lane.b32.xlu1 %v2172_v8, %s2422_s30 }
 0x8c5   :  { %2183 = vrot.lane.b32.xlu1 %v2182_v28, %s2423_s18 }
 0x929   :  { %v1227_v17 = vpop.xlane.xlu0 %1226 }
 0x92a   :  { %2267 = vrcp.f32 %v1227_v17  ;;  %v2299_v17 = vld [vmem:[%s2970_s0 + $0x10] sm:$0xff] }
 0x92d   :  { %v1221_v49 = vpop.xlane.xlu0 %1220  ;;  %v1230_v18 = vpop.xlane.xlu1 %1229 }
 0x92e   :  { %2269 = vrcp.f32 %v1230_v18 }
 0x92f   :  { %2271 = vrcp.f32 %v1221_v49 }
 0x931   :  { %v1242_v51 = vpop.permute.xlu0 %1241  ;;  %v1224_v19 = vpop.xlane.xlu1 %1223 }
 0x932   :  { %2273 = vrcp.f32 %v1224_v19  ;;  %2112 = vmatpush3.bf16.msra.mxu1 %v1242_v51  ;;  %v2300_v19 = vld [vmem:[%s2970_s0] sm:$0xff] }
 0x933   :  { %2123 = vmatprep.subr.bf16.mxu1 %v2203_v25 }
 0x935   :  { %v1289_v6 = vpop.permute.xlu1 %1288  ;;  %v2179_v45 = vpop.permute.xlu0 %2178 }
 0x936   :  { %2118 = vmatpush3.bf16.msra.mxu0 %v1289_v6  ;;  %v2181_v61 = vunpack.i.h.bf16 %v2179_v45  ;;  %v2180_v62 = vunpack.i.l.bf16 %v2179_v45 }
 0x937   :  { %v2268_v11 = vpop.eup %2267 }
 0x938   :  { %v1237_v21 = vmul.f32 %v2268_v11, %v2260_v5 }
 0x939   :  { %v2169_v41 = vpop.permute.xlu1 %2168 }
 0x93a   :  { %v2171_v43 = vunpack.i.h.bf16 %v2169_v41  ;;  %v2170_v44 = vunpack.i.l.bf16 %v2169_v41 }
 0x93b   :  { %v2270_v13 = vpop.eup %2269 }
 0x93c   :  { %v2272_v20 = vpop.eup %2271  ;;  %v1238_v22 = vmul.f32 %v2270_v13, %v2264_v10  ;;  %v1384_v58 = vsel %vm355_vm2, %v2659_v60, %v2171_v43  ;;  %v1383_v59 = vsel %vm355_vm2, %v2655_v56, %v2170_v44 }
 0x93d   :  { %v1235_v8 = vmul.f32 %v2272_v20, %v2262_v39  ;;  %v2174_v12 = vpop.permute.xlu1 %2173  ;;  %v1387_v56 = vsel %vm456_vm4, %v1383_v59, %v2180_v62  ;;  %v1388_v9 = vsel %vm456_vm4, %v1384_v58, %v2181_v61 }
 0x93e   :  { %v1240_v7 = vpack.c.bf16 %v1238_v22, %v1237_v21  ;;  %v2176_v46 = vunpack.i.h.bf16 %v2174_v12  ;;  %v2175_v47 = vunpack.i.l.bf16 %v2174_v12  ;;  %v2301_v22 = vld [vmem:[%s2970_s0 + $0x18] sm:$0xff] }
 0x93f   :  { %v2274_v4 = vpop.eup %2273 }
 0x940   :  { %v1236_v23 = vmul.f32 %v2274_v4, %v2266_v15  ;;  %2120 = vmatmul.mubr.msk.bf16.vlgmr.msra.gmra.mxu0 %vm456_vm4, %v1240_v7  ;;  %v1386_v63 = vsel %vm355_vm2, %v2657_v57, %v2176_v46  ;;  %v1385_v0 = vsel %vm355_vm2, %v2653_v54, %v2175_v47  ;;  %v1924_v54 = vld [vmem:[%s2955_s8] ss:$0 sm:$0xff]  ;;  %v2302_v7 = vld [vmem:[%s2970_s0 + $0x8] sm:$0xff] }
 0x941   :  { %v2184_v42 = vpop.permute.xlu1 %2183 }
 0x942   :  { %v1239_v24 = vpack.c.bf16 %v1236_v23, %v1235_v8  ;;  %v2186_v31 = vunpack.i.h.bf16 %v2184_v42  ;;  %v2185_v48 = vunpack.i.l.bf16 %v2184_v42 }
 0x944   :  { %2114 = vmatmul.mubr.msk.bf16.vlgmr.msra.gmra.mxu1 %vm456_vm4, %v1239_v24  ;;  %v1389_v2 = vsel %vm456_vm4, %v1385_v0, %v2185_v48  ;;  %v1390_v3 = vsel %vm456_vm4, %v1386_v63, %v2186_v31 }
 0x945   :  { %2124 = vmatpush3.bf16.msra.mxu1 %v2203_v25 }
 0x946   :  { %2125 = vmatprep.subr.bf16.mxu1 %v2204_v27 }
 0x949   :  { %2126 = vmatpush3.bf16.msra.mxu1 %v2204_v27 }
 0xa00   :  { %v1328_v28 = vpop.f32.mrf.mxu0 }
 0xa02   :  { %v2121_v29 = vpop.f32.mrf.mxu0 }
 0xa04   :  { %v1281_v30 = vpop.f32.mrf.mxu1  ;;  %v1331_v32 = vpop.f32.mrf.mxu0 }
 0xa05   :  { %v2192_v33 = vpack.i.bf16 %v1331_v32, %v1328_v28 }
 0xa06   :  { %v2115_v34 = vpop.f32.mrf.mxu1  ;;  %v2122_v35 = vpop.f32.mrf.mxu0 }
 0xa07   :  { %2193 = vrot.lane.b32.xlu1 %v2192_v33, %s2424_s19 }
 0xa08   :  { %v1284_v36 = vpop.f32.mrf.mxu1 }
 0xa09   :  { %v2187_v37 = vpack.i.bf16 %v1284_v36, %v1281_v30  ;;  %v2205_v36 = vld [vmem:[#allocation8 + $0x8] sm:$0xff]  }
 0xa0a   :  { %v2116_v38 = vpop.f32.mrf.mxu1  ;;  %2131 = vmatprep.subr.bf16.mxu0 %v2205_v36 }
 0xa0b   :  { %2188 = vrot.lane.b32.xlu0 %v2187_v37, %s2424_s19  ;;  %v2206_v37 = vld [vmem:[#allocation8] sm:$0xff]   ;;  %2132 = vmatpush3.bf16.msra.mxu0 %v2205_v36 }
 0xa0c   :  { %2133 = vmatprep.subr.bf16.mxu0 %v2206_v37 }
 0xa0f   :  { %2134 = vmatpush3.bf16.msra.mxu0 %v2206_v37 }
 0xa79   :  { %v2194_v50 = vpop.permute.xlu1 %2193 }
 0xa7a   :  { %v2196_v52 = vunpack.i.h.bf16 %v2194_v50  ;;  %v2195_v55 = vunpack.i.l.bf16 %v2194_v50 }
 0xa7c   :  { %v1394_v60 = vsel %vm1391_vm5, %v1389_v2, %v2195_v55  ;;  %v1395_v5 = vsel %vm1391_vm5, %v1390_v3, %v2196_v52 }
 0xa7d   :  { %v2189_v1 = vpop.permute.xlu0 %2188  ;;  %v1397_v57 = vpack.c.bf16 %v1395_v5, %v1394_v60 }
 0xa7e   :  { %v2191_v26 = vunpack.i.h.bf16 %v2189_v1  ;;  %v2190_v53 = vunpack.i.l.bf16 %v2189_v1 }
 0xa80   :  { %v1393_v39 = vsel %vm1391_vm5, %v1388_v9, %v2191_v26  ;;  %v1392_v10 = vsel %vm1391_vm5, %v1387_v56, %v2190_v53 }
 0xa81   :  { %v1396_v14 = vpack.c.bf16 %v1393_v39, %v1392_v10 }
 0xa83   :  { %2127 = vmatprep.mubr.msk.bf16.mxu1 %vm142_vm0, %v1396_v14 }
 0xa84   :  { %2128 = vmatmul.mubr.msk.bf16.vlgmr.msra.gmra.mxu1 %vm142_vm0, %v1397_v57 }
 0xb44   :  { %v2129_v40 = vpop.f32.mrf.mxu1 }
 0xb45   :  { %v1470_v15 = vadd.f32 %v2129_v40, %v1924_v54  ;;  %v1929_v40 = vld [vmem:[%s2956_s9] ss:$0 sm:$0xff] }
 0xb46   :  { %v1461_v16 = vpop.f32.mrf.mxu1 }
 0xb47   :  { %v2818_v49 = vadd.f32 %v2299_v17, %v1470_v15  ;;  %v1462_v18 = vadd.f32 %v1924_v54, %v1461_v16 }
 0xb48   :  { %v2130_v51 = vpop.f32.mrf.mxu1 }
 0xb49   :  { %v2823_v6 = vadd.f32 %v2300_v19, %v1462_v18  ;;  %v1473_v11 = vadd.f32 %v2130_v51, %v1924_v54  ;;  %v1488_v13 = vsel %vm142_vm0, %v2818_v49, 0.0  ;;  %v1501_v33 = vmul.f32 %v2818_v49, %v2818_v49 }
 0xb4a   :  { %1489 = vadd.xlane.f32.xlu0 %v1488_v13  ;;  %v1464_v20 = vpop.f32.mrf.mxu1  ;;  %v1930_v13 = vld [vmem:[%s2957_s10] ss:$0 sm:$0xff] }
 0xb4b   :  { %v1465_v21 = vadd.f32 %v1924_v54, %v1464_v20  ;;  %v2830_v4 = vadd.f32 %v2301_v22, %v1473_v11  ;;  %v1482_v23 = vsel %vm142_vm0, %v2823_v6, 0.0  ;;  %v1499_v28 = vmul.f32 %v2823_v6, %v2823_v6 }
 0xb4c   :  { %v1509_v35 = vsel %vm142_vm0, %v1501_v33, 0.0  ;;  %v2210_v33 = vld [vmem:[%s2960_s13] sm:$0xff]  }
 0xb4d   :  { %v2835_v8 = vadd.f32 %v2302_v7, %v1465_v21  ;;  %v1491_v27 = vsel %vm142_vm0, %v2830_v4, 0.0  ;;  %v1502_v30 = vmul.f32 %v2830_v4, %v2830_v4  ;;  %v1503_v32 = vsel %vm142_vm0, %v1499_v28, 0.0 }
 0xb4e   :  { %1483 = vadd.xlane.f32.xlu0 %v1482_v23 }
 0xb4f   :  { %v1485_v24 = vsel %vm142_vm0, %v2835_v8, 0.0  ;;  %v1500_v25 = vmul.f32 %v2835_v8, %v2835_v8  ;;  %v1512_v34 = vsel %vm142_vm0, %v1502_v30, 0.0  ;;  %v2208_v30 = vld [vmem:[%s2960_s13 + $0x10] sm:$0xff]  }
 0xb50   :  { %1486 = vadd.xlane.f32.xlu1 %v1485_v24 }
 0xb51   :  { %v1506_v29 = vsel %vm142_vm0, %v1500_v25, 0.0 }
 0xb52   :  { %1492 = vadd.xlane.f32.xlu0 %v1491_v27 }
 0xb54   :  { %1507 = vadd.xlane.f32.xlu1 %v1506_v29  ;;  %v2207_v29 = vld [vmem:[%s2960_s13 + $0x18] sm:$0xff]  }
 0xb55   :  { %2139 = vmatprep.subr.bf16.mxu1 %v2207_v29 }
 0xb56   :  { %1504 = vadd.xlane.f32.xlu0 %v1503_v32  ;;  %2140 = vmatpush3.bf16.msra.mxu1 %v2207_v29  ;;  %v2209_v32 = vld [vmem:[%s2960_s13 + $0x8] sm:$0xff]  }
 0xb57   :  { %2141 = vmatprep.subr.bf16.mxu1 %v2208_v30 }
 0xb58   :  { %1513 = vadd.xlane.f32.xlu1 %v1512_v34  ;;  %v1931_v34 = vld [vmem:[%s2959_s12] ss:$0 sm:$0xff] }
 0xb5a   :  { %1510 = vadd.xlane.f32.xlu0 %v1509_v35  ;;  %2142 = vmatpush3.bf16.msra.mxu1 %v2208_v30 }
 0xb5b   :  { %2143 = vmatprep.subr.bf16.mxu1 %v2209_v32 }
 0xb5e   :  { %2144 = vmatpush3.bf16.msra.mxu1 %v2209_v32 }
 0xb5f   :  { %2145 = vmatprep.subr.bf16.mxu1 %v2210_v33 }
 0xb62   :  { %2146 = vmatpush3.bf16.msra.mxu1 %v2210_v33 }
 0xbd3   :  { %v1490_v38 = vpop.xlane.xlu0 %1489 }
 0xbd4   :  { %v1497_v48 = vmul.f32 0.03125, %v1490_v38 }
 0xbd6   :  { %v1521_v1 = vmul.f32 %v1497_v48, %v1497_v48  ;;  %v1533_v20 = vsub.f32 %v2818_v49, %v1497_v48 }
 0xbd7   :  { %v1484_v41 = vpop.xlane.xlu0 %1483 }
 0xbd8   :  { %v1495_v44 = vmul.f32 0.03125, %v1484_v41 }
 0xbd9   :  { %v1487_v12 = vpop.xlane.xlu1 %1486 }
 0xbda   :  { %v1496_v42 = vmul.f32 0.03125, %v1487_v12  ;;  %v1519_v52 = vmul.f32 %v1495_v44, %v1495_v44  ;;  %v1531_v15 = vsub.f32 %v2823_v6, %v1495_v44 }
 0xbdb   :  { %v1493_v43 = vpop.xlane.xlu0 %1492 }
 0xbdc   :  { %v1520_v46 = vmul.f32 %v1496_v42, %v1496_v42  ;;  %v1498_v47 = vmul.f32 0.03125, %v1493_v43  ;;  %v1532_v57 = vsub.f32 %v2835_v8, %v1496_v42 }
 0xbdd   :  { %v1508_v45 = vpop.xlane.xlu1 %1507 }
 0xbde   :  { %v1516_v31 = vmul.f32 0.03125, %v1508_v45  ;;  %v1522_v61 = vmul.f32 %v1498_v47, %v1498_v47  ;;  %v1534_v18 = vsub.f32 %v2830_v4, %v1498_v47 }
 0xbdf   :  { %v1505_v50 = vpop.xlane.xlu0 %1504 }
 0xbe0   :  { %v1524_v55 = vsub.f32 %v1516_v31, %v1520_v46  ;;  %v1515_v58 = vmul.f32 0.03125, %v1505_v50 }
 0xbe1   :  { %v1514_v59 = vpop.xlane.xlu1 %1513 }
 0xbe2   :  { %v1528_v62 = vmax.f32 %v1524_v55, 0.0  ;;  %v1523_v63 = vsub.f32 %v1515_v58, %v1519_v52  ;;  %v1518_v0 = vmul.f32 0.03125, %v1514_v59 }
 0xbe3   :  { %v1511_v2 = vpop.xlane.xlu0 %1510 }
 0xbe4   :  { %v1536_v3 = vadd.f32 1e-05, %v1528_v62  ;;  %v1527_v26 = vmax.f32 %v1523_v63, 0.0  ;;  %v1526_v53 = vsub.f32 %v1518_v0, %v1522_v61  ;;  %v1517_v60 = vmul.f32 0.03125, %v1511_v2 }
 0xbe6   :  { %2275 = vrsqrt.f32 %v1536_v3  ;;  %v1535_v5 = vadd.f32 1e-05, %v1527_v26  ;;  %v1530_v56 = vmax.f32 %v1526_v53, 0.0  ;;  %v1525_v9 = vsub.f32 %v1517_v60, %v1521_v1 }
 0xbe8   :  { %2277 = vrsqrt.f32 %v1535_v5  ;;  %v1538_v39 = vadd.f32 1e-05, %v1530_v56  ;;  %v1529_v10 = vmax.f32 %v1525_v9, 0.0 }
 0xbea   :  { %2279 = vrsqrt.f32 %v1538_v39  ;;  %v1537_v14 = vadd.f32 1e-05, %v1529_v10 }
 0xbec   :  { %2281 = vrsqrt.f32 %v1537_v14 }
 0xbf3   :  { %v2276_v54 = vpop.eup %2275 }
 0xbf4   :  { %v1544_v16 = vmul.f32 %v2276_v54, %v1532_v57 }
 0xbf5   :  { %v2278_v17 = vpop.eup %2277 }
 0xbf6   :  { %v1543_v51 = vmul.f32 %v2278_v17, %v1531_v15  ;;  %v1554_v19 = vmul.f32 %v1929_v40, %v1544_v16 }
 0xbf7   :  { %v2280_v11 = vpop.eup %2279 }
 0xbf8   :  { %v1553_v21 = vmul.f32 %v1929_v40, %v1543_v51  ;;  %v1546_v22 = vmul.f32 %v2280_v11, %v1534_v18  ;;  %v2867_v23 = vadd.f32 %v1930_v13, %v1554_v19 }
 0xbf9   :  { %v2282_v7 = vpop.eup %2281 }
 0xbfa   :  { %v2865_v8 = vadd.f32 %v1930_v13, %v1553_v21  ;;  %v1545_v6 = vmul.f32 %v2282_v7, %v1533_v20  ;;  %v1556_v24 = vmul.f32 %v1929_v40, %v1546_v22  ;;  %v1936_v20 = vld [vmem:[%s2961_s14] ss:$0 sm:$0xff] }
 0xbfc   :  { %v1567_v4 = vpack.c.bf16 %v2867_v23, %v2865_v8  ;;  %v1555_v25 = vmul.f32 %v1929_v40, %v1545_v6  ;;  %v2874_v28 = vadd.f32 %v1930_v13, %v1556_v24 }
 0xbfe   :  { %2135 = vmatprep.mubr.msk.bf16.mxu0 %vm142_vm0, %v1567_v4  ;;  %v2872_v27 = vadd.f32 %v1930_v13, %v1555_v25 }
 0xc00   :  { %v1568_v49 = vpack.c.bf16 %v2874_v28, %v2872_v27 }
 0xc02   :  { %2136 = vmatmul.mubr.msk.bf16.vlgmr.msra.gmra.mxu0 %vm142_vm0, %v1568_v49 }
 0xcc2   :  { %v2137_v35 = vpop.f32.mrf.mxu0 }
 0xcc3   :  { %v1641_v36 = vadd.f32 %v2137_v35, %v1931_v34 }
 0xcc4   :  { %v1632_v37 = vpop.f32.mrf.mxu0 }
 0xcc5   :  { %v1653_v38 = vmul.f32 0.044715, %v1641_v36  ;;  %v1633_v41 = vadd.f32 %v1931_v34, %v1632_v37  ;;  %v1649_v16 = vmul.f32 0.5, %v1641_v36 }
 0xcc6   :  { %v2138_v12 = vpop.f32.mrf.mxu0 }
 0xcc7   :  { %v1657_v42 = vmul.f32 %v1653_v38, %v1641_v36  ;;  %v1651_v43 = vmul.f32 0.044715, %v1633_v41  ;;  %v1644_v44 = vadd.f32 %v2138_v12, %v1931_v34  ;;  %v1647_v54 = vmul.f32 0.5, %v1633_v41 }
 0xcc8   :  { %v1635_v45 = vpop.f32.mrf.mxu0 }
 0xcc9   :  { %v1661_v46 = vmul.f32 %v1657_v42, %v1641_v36  ;;  %v1655_v47 = vmul.f32 %v1651_v43, %v1633_v41  ;;  %v1654_v31 = vmul.f32 0.044715, %v1644_v44  ;;  %v1636_v48 = vadd.f32 %v1931_v34, %v1635_v45 }
 0xcca   :  { %v1650_v14 = vmul.f32 0.5, %v1644_v44 }
 0xccb   :  { %v1665_v50 = vadd.f32 %v1661_v46, %v1641_v36  ;;  %v1659_v52 = vmul.f32 %v1655_v47, %v1633_v41  ;;  %v1658_v55 = vmul.f32 %v1654_v31, %v1644_v44  ;;  %v1652_v58 = vmul.f32 0.044715, %v1636_v48 }
 0xccc   :  { %v1648_v40 = vmul.f32 0.5, %v1636_v48 }
 0xccd   :  { %v1669_v59 = vmul.f32 0.7978846, %v1665_v50  ;;  %v1663_v61 = vadd.f32 %v1659_v52, %v1633_v41  ;;  %v1662_v62 = vmul.f32 %v1658_v55, %v1644_v44  ;;  %v1656_v63 = vmul.f32 %v1652_v58, %v1636_v48 }
 0xccf   :  { %v1667_v0 = vmul.f32 0.7978846, %v1663_v61  ;;  %v1666_v1 = vadd.f32 %v1662_v62, %v1644_v44  ;;  %v1660_v2 = vmul.f32 %v1656_v63, %v1636_v48  ;;  %2283 = vtanh.f32 %v1669_v59 }
 0xcd1   :  { %v1670_v3 = vmul.f32 0.7978846, %v1666_v1  ;;  %2285 = vtanh.f32 %v1667_v0  ;;  %v1664_v26 = vadd.f32 %v1660_v2, %v1636_v48 }
 0xcd3   :  { %2287 = vtanh.f32 %v1670_v3  ;;  %v1668_v53 = vmul.f32 0.7978846, %v1664_v26 }
 0xcd5   :  { %2289 = vtanh.f32 %v1668_v53 }
 0xcdc   :  { %v2284_v60 = vpop.eup %2283 }
 0xcdd   :  { %v1677_v57 = vadd.f32 1.0, %v2284_v60 }
 0xcde   :  { %v2286_v5 = vpop.eup %2285 }
 0xcdf   :  { %v1675_v39 = vadd.f32 1.0, %v2286_v5  ;;  %v1681_v19 = vmul.f32 %v1677_v57, %v1649_v16 }
 0xce0   :  { %v2288_v56 = vpop.eup %2287 }
 0xce1   :  { %v1678_v9 = vadd.f32 1.0, %v2288_v56  ;;  %v1679_v18 = vmul.f32 %v1675_v39, %v1647_v54 }
 0xce2   :  { %v2290_v10 = vpop.eup %2289 }
 0xce3   :  { %v1676_v15 = vadd.f32 1.0, %v2290_v10  ;;  %v1682_v17 = vmul.f32 %v1678_v9, %v1650_v14 }
 0xce5   :  { %v1680_v51 = vmul.f32 %v1676_v15, %v1648_v40  ;;  %v1684_v13 = vpack.c.bf16 %v1682_v17, %v1681_v19  ;;  %v1944_v19 = vld [vmem:[%s2963_s16] ss:$0 sm:$0xff] }
 0xce7   :  { %v1683_v11 = vpack.c.bf16 %v1680_v51, %v1679_v18  ;;  %v1943_v18 = vld [vmem:[%s2962_s15] ss:$0 sm:$0xff]  ;;  %s2425_s15 = smov [#allocation10]  }
 0xce8   :  { %s1879_s16 = sshll.u32 %s2425_s15, 4  ;;  %s1880_s16 = int_to_ptr.vmem [resolvable:$true] %s1879_s16 }
 0xce9   :  { %2147 = vmatprep.mubr.msk.bf16.mxu1 %vm1724_vm6, %v1683_v11  ;;  %s2383_s20 = scalar_lea.vmem %s1880_s16, 512  ;;  %p2388_p7 = scmp.lt.s32.totalorder %s1880_s16, %s1880_s16 }
 0xcea   :  { %2148 = vmatmul.mubr.msk.bf16.vlgmr.msra.gmra.mxu1 %vm1724_vm6, %v1684_v13  ;;  %p2384_p6 = scmp.ne.s32.totalorder %s1880_s16, %s2383_s20  ;;  %p2389_p8 = scmp.lt.s32.totalorder %s2383_s20, %s2383_s20 }
 0xcec   :  { %p2390_p9 = por %p2389_p8, %p2388_p7 }
 0xcee   :  { %p2391_p10 = pnand %p2390_p9, %p2384_p6 }
 0xdaa   :  { %v2149_v21 = vpop.f32.mrf.mxu1 }
 0xdab   :  { %v1774_v22 = vadd.f32 %v2149_v21, %v1936_v20 }
 0xdac   :  { %v1765_v7 = vpop.f32.mrf.mxu1 }
 0xdad   :  { %v2898_v6 = vadd.f32 %v1774_v22, %v2872_v27  ;;  %v1766_v24 = vadd.f32 %v1936_v20, %v1765_v7 }
 0xdae   :  { %v2150_v4 = vpop.f32.mrf.mxu1 }
 0xdaf   :  { %v2901_v25 = vadd.f32 %v1766_v24, %v2865_v8  ;;  %v1777_v49 = vadd.f32 %v2150_v4, %v1936_v20  ;;  %v1792_v29 = vsel %vm142_vm0, %v2898_v6, 0.0  ;;  %v1804_v37 = vmul.f32 %v2898_v6, %v2898_v6 }
 0xdb0   :  { %1793 = vadd.xlane.f32.xlu0 %v1792_v29  ;;  %v1768_v30 = vpop.f32.mrf.mxu1 }
 0xdb1   :  { %v2906_v32 = vadd.f32 %v1777_v49, %v2874_v28  ;;  %v1769_v33 = vadd.f32 %v1936_v20, %v1768_v30  ;;  %v1786_v8 = vsel %vm142_vm0, %v2901_v25, 0.0  ;;  %v1802_v35 = vmul.f32 %v2901_v25, %v2901_v25 }
 0xdb2   :  { %v1812_v41 = vsel %vm142_vm0, %v1804_v37, 0.0 }
 0xdb3   :  { %v2909_v34 = vadd.f32 %v1769_v33, %v2867_v23  ;;  %v1795_v27 = vsel %vm142_vm0, %v2906_v32, 0.0  ;;  %v1806_v28 = vsel %vm142_vm0, %v1802_v35, 0.0  ;;  %v1805_v12 = vmul.f32 %v2906_v32, %v2906_v32 }
 0xdb4   :  { %1796 = vadd.xlane.f32.xlu1 %v1795_v27  ;;  %1787 = vadd.xlane.f32.xlu0 %v1786_v8 }
 0xdb5   :  { %v1789_v36 = vsel %vm142_vm0, %v2909_v34, 0.0  ;;  %v1803_v23 = vmul.f32 %v2909_v34, %v2909_v34  ;;  %v1815_v42 = vsel %vm142_vm0, %v1805_v12, 0.0 }
 0xdb7   :  { %v1809_v38 = vsel %vm142_vm0, %v1803_v23, 0.0 }
 0xdb8   :  { %1790 = vadd.xlane.f32.xlu1 %v1789_v36  ;;  %1807 = vadd.xlane.f32.xlu0 %v1806_v28 }
 0xdbc   :  { %1810 = vadd.xlane.f32.xlu1 %v1809_v38  ;;  %1813 = vadd.xlane.f32.xlu0 %v1812_v41 }
 0xdc0   :  { %1816 = vadd.xlane.f32.xlu1 %v1815_v42 }
 0xe39   :  { %v1794_v43 = vpop.xlane.xlu0 %1793 }
 0xe3a   :  { %v1800_v47 = vmul.f32 0.03125, %v1794_v43 }
 0xe3c   :  { %v1824_v59 = vmul.f32 %v1800_v47, %v1800_v47  ;;  %v1836_v21 = vsub.f32 %v2898_v6, %v1800_v47 }
 0xe3d   :  { %v1797_v44 = vpop.xlane.xlu1 %1796  ;;  %v1788_v45 = vpop.xlane.xlu0 %1787 }
 0xe3e   :  { %v1798_v46 = vmul.f32 0.03125, %v1788_v45  ;;  %v1801_v61 = vmul.f32 0.03125, %v1797_v44 }
 0xe40   :  { %v1822_v50 = vmul.f32 %v1798_v46, %v1798_v46  ;;  %v1825_v5 = vmul.f32 %v1801_v61, %v1801_v61  ;;  %v1834_v16 = vsub.f32 %v2901_v25, %v1798_v46  ;;  %v1837_v25 = vsub.f32 %v2906_v32, %v1801_v61 }
 0xe41   :  { %v1791_v31 = vpop.xlane.xlu1 %1790  ;;  %v1808_v48 = vpop.xlane.xlu0 %1807 }
 0xe42   :  { %v1799_v52 = vmul.f32 0.03125, %v1791_v31  ;;  %v1818_v55 = vmul.f32 0.03125, %v1808_v48 }
 0xe44   :  { %v1826_v58 = vsub.f32 %v1818_v55, %v1822_v50  ;;  %v1823_v0 = vmul.f32 %v1799_v52, %v1799_v52  ;;  %v1835_v11 = vsub.f32 %v2909_v34, %v1799_v52 }
 0xe45   :  { %v1811_v62 = vpop.xlane.xlu1 %1810  ;;  %v1814_v63 = vpop.xlane.xlu0 %1813 }
 0xe46   :  { %v1830_v1 = vmax.f32 %v1826_v58, 0.0  ;;  %v1819_v2 = vmul.f32 0.03125, %v1811_v62  ;;  %v1820_v3 = vmul.f32 0.03125, %v1814_v63 }
 0xe48   :  { %v1838_v26 = vadd.f32 1e-05, %v1830_v1  ;;  %v1827_v53 = vsub.f32 %v1819_v2, %v1823_v0  ;;  %v1828_v60 = vsub.f32 %v1820_v3, %v1824_v59 }
 0xe49   :  { %v1817_v56 = vpop.xlane.xlu1 %1816 }
 0xe4a   :  { %2291 = vrsqrt.f32 %v1838_v26  ;;  %v1831_v9 = vmax.f32 %v1827_v53, 0.0  ;;  %v1832_v39 = vmax.f32 %v1828_v60, 0.0  ;;  %v1821_v10 = vmul.f32 0.03125, %v1817_v56 }
 0xe4c   :  { %v1839_v14 = vadd.f32 1e-05, %v1831_v9  ;;  %v1840_v57 = vadd.f32 1e-05, %v1832_v39  ;;  %v1829_v54 = vsub.f32 %v1821_v10, %v1825_v5 }
 0xe4e   :  { %2293 = vrsqrt.f32 %v1839_v14  ;;  %v1833_v40 = vmax.f32 %v1829_v54, 0.0 }
 0xe4f   :  { %2295 = vrsqrt.f32 %v1840_v57 }
 0xe50   :  { %v1841_v15 = vadd.f32 1e-05, %v1833_v40 }
 0xe52   :  { %2297 = vrsqrt.f32 %v1841_v15 }
 0xe57   :  { %v2292_v17 = vpop.eup %2291 }
 0xe58   :  { %v1846_v51 = vmul.f32 %v2292_v17, %v1834_v16 }
 0xe5a   :  { %v1856_v13 = vmul.f32 %v1943_v18, %v1846_v51 }
 0xe5b   :  { %v2294_v20 = vpop.eup %2293 }
 0xe5c   :  { %v2296_v22 = vpop.eup %2295  ;;  %v1847_v7 = vmul.f32 %v2294_v20, %v1835_v11  ;;  %v1866_v24 = vadd.f32 %v1944_v19, %v1856_v13 }
 0xe5d   :  { %v1848_v4 = vmul.f32 %v2296_v22, %v1836_v21 }
 0xe5e   :  { %v1857_v49 = vmul.f32 %v1943_v18, %v1847_v7  ;;  %1870 = vst.msk [vmem:[#allocation10] sm:$0xff] %vm142_vm0, %v1866_v24 }
 0xe5f   :  { %v2298_v29 = vpop.eup %2297  ;;  %v1858_v30 = vmul.f32 %v1943_v18, %v1848_v4 }
 0xe60   :  { %v1849_v33 = vmul.f32 %v2298_v29, %v1837_v25  ;;  %v1867_v27 = vadd.f32 %v1944_v19, %v1857_v49 }
 0xe61   :  { %v1868_v8 = vadd.f32 %v1944_v19, %v1858_v30 }
 0xe62   :  { %v1859_v34 = vmul.f32 %v1943_v18, %v1849_v33  ;;  %1871 = vst.msk [vmem:[#allocation10 + $0x8] sm:$0xff] %vm142_vm0, %v1867_v27 }
 0xe63   :  { %1872 = vst.msk [vmem:[#allocation10 + $0x10] sm:$0xff] %vm142_vm0, %v1868_v8 }
 0xe64   :  { %v1869_v6 = vadd.f32 %v1944_v19, %v1859_v34 }
 0xe66   :  { %1873 = vst.msk [vmem:[#allocation10 + $0x18] sm:$0xff] %vm142_vm0, %v1869_v6 }
 0xe67   :  { %2394 = shalt.err (!%p2391_p10)
}
 0xe68   :  { %s2426_s21 = smov 128  }
 0xe69   :  { %1885 = dma.vmem_to_hbm [thread:$0]  %s1880_s16, 512, %s2964_s17, [#allocation4], %s2426_s21, %s2426_s21, %s2422_s30  }
 0xe6a   :  { %2409 = dma.done.wait [#allocation4], 512  }
 0xe6b   :  { %2410 = vsyncadd [#allocation4], 4294966784 }
 0xe6c   :  { %1889 = vsyncpa [#allocation3], 1 }
 0xe6d   :  { %1890 = vsyncpa [#allocation6], 1 }
 0xe6e   :  { %1891 = vsyncpa [#allocation9], 1 }
 0xe6f   :  { %1892 = vsyncpa [#allocation4], 1 }

</bundles_post_ra>
